<compile_context>
chip_gen: v7x
topology: tpu7x:2x2x1
jax: 0.10.0
libtpu: 0.0.40
codegen_flags: <defaults>
</compile_context>

<pallas_src>
import numpy as np
import jax
import jax.numpy as jnp
from jax.experimental import pallas as pl
from jax.experimental.pallas import tpu as pltpu


# --------------------------------------------------------------------------- #
# Kernel
# --------------------------------------------------------------------------- #
def _encoder7x7_kernel(x_ref,
                       s1_ref, r1_ref, b1_ref,
                       s2_ref, r2_ref, b2_ref,
                       s3_ref, r3_ref, b3_ref,
                       wmu_ref, bmu_ref, wvar_ref, bvar_ref,
                       mu_ref, var_ref):
    def conv(a, s_ref, r_ref, b_ref):
        acc = None
        for dy in range(3):  # static unroll over the 3 kernel rows
            t = jnp.dot(s_ref[dy], a, preferred_element_type=jnp.float32)
            t = jnp.dot(t, r_ref[dy], preferred_element_type=jnp.float32)
            acc = t if acc is None else acc + t
        return acc + b_ref[...]  # (1, Wo*Cout) bias row broadcasts over rows

    def elu(v):  # torch.nn.ELU(alpha=1)
        return jnp.where(v > 0, v, jnp.exp(jnp.minimum(v, 0.0)) - 1.0)

    a0 = x_ref[...]                              # (N*7, 7)   lanes = W*Cin
    a1 = elu(conv(a0, s1_ref, r1_ref, b1_ref))   # (N*5, 5*H)
    a2 = elu(conv(a1, s2_ref, r2_ref, b2_ref))   # (N*3, 3*2H)
    a3 = elu(conv(a2, s3_ref, r3_ref, b3_ref))   # (N,   2H)  == hidden[:, :, 0, 0]

    mu = jnp.dot(a3, wmu_ref[...], preferred_element_type=jnp.float32) + bmu_ref[...]
    pre = jnp.dot(a3, wvar_ref[...], preferred_element_type=jnp.float32) + bvar_ref[...]
    # numerically-stable softplus: max(x,0) + log(1 + exp(-|x|))
    var = jnp.maximum(pre, 0.0) + jnp.log(1.0 + jnp.exp(-jnp.abs(pre)))

    mu_ref[...] = mu.astype(mu_ref.dtype)
    var_ref[...] = var.astype(var_ref.dtype)


# --------------------------------------------------------------------------- #
# Host-side weight packing (layout plumbing, done once)
# --------------------------------------------------------------------------- #
def _pack_conv_params(w, b, h_in, w_in, n_batch):
    """Pack a PyTorch OIHW 3x3 'valid' conv into (S, R, bias_row) matrices for
    the rows = N*H, lanes = W*C activation layout."""
    w = np.asarray(w, np.float32)
    b = np.asarray(b, np.float32)
    c_out, c_in, kh, kw = w.shape
    h_out, w_out = h_in - kh + 1, w_in - kw + 1

    S = np.zeros((kh, n_batch * h_out, n_batch * h_in), np.float32)
    R = np.zeros((kh, w_in * c_in, w_out * c_out), np.float32)
    for dy in range(kh):
        for n in range(n_batch):
            for oy in range(h_out):
                S[dy, n * h_out + oy, n * h_in + oy + dy] = 1.0
        for ox in range(w_out):
            for dx in range(kw):
                x = ox + dx
                R[dy, x * c_in:(x + 1) * c_in, ox * c_out:(ox + 1) * c_out] = w[:, :, dy, dx].T
    bias_row = np.tile(b, w_out).reshape(1, w_out * c_out)
    return jnp.asarray(S), jnp.asarray(R), jnp.asarray(bias_row), h_out, w_out


def _full_spec(shape):
    nd = len(shape)
    return pl.BlockSpec(tuple(shape), lambda i, _nd=nd: (0,) * _nd)


# --------------------------------------------------------------------------- #
# Wrapper (== Encoder7x7.forward)
# --------------------------------------------------------------------------- #
def encoder7x7_forward(x, params):
    (w1, b1, w2, b2, w3, b3, wmu, bmu, wvar, bvar) = params
    n, c_in, hgt, wid = x.shape
    assert c_in == 1 and hgt == 7 and wid == 7, "Encoder7x7 expects (N, 1, 7, 7) input"
    hidden = w1.shape[0]
    z_dim = wmu.shape[0]

    # rows = N*H, lanes = W*C layout; for (N,1,7,7) this is a free reshape.
    a0 = x.astype(jnp.float32).reshape(n * 7, 7)

    s1, r1, bb1, h1, w1s = _pack_conv_params(w1, b1, 7, 7, n)      # 7x7 -> 5x5
    s2, r2, bb2, h2, w2s = _pack_conv_params(w2, b2, h1, w1s, n)   # 5x5 -> 3x3
    s3, r3, bb3, h3, w3s = _pack_conv_params(w3, b3, h2, w2s, n)   # 3x3 -> 1x1
    assert h3 == 1 and w3s == 1

    wmu_m = jnp.asarray(np.asarray(wmu, np.float32)[:, :, 0, 0].T)     # (2H, z)
    wvar_m = jnp.asarray(np.asarray(wvar, np.float32)[:, :, 0, 0].T)   # (2H, z)
    bmu_r = jnp.asarray(np.asarray(bmu, np.float32).reshape(1, z_dim))
    bvar_r = jnp.asarray(np.asarray(bvar, np.float32).reshape(1, z_dim))

    inputs = [a0, s1, r1, bb1, s2, r2, bb2, s3, r3, bb3, wmu_m, bmu_r, wvar_m, bvar_r]

    mu, var = pl.pallas_call(
        _encoder7x7_kernel,
        out_shape=(jax.ShapeDtypeStruct((n, z_dim), jnp.float32),
                   jax.ShapeDtypeStruct((n, z_dim), jnp.float32)),
        grid_spec=pltpu.PrefetchScalarGridSpec(
            num_scalar_prefetch=0,
            grid=(1,),  # collapsed grid: everything fits VMEM, one DMA in/out
            in_specs=[_full_spec(t.shape) for t in inputs],
            out_specs=[_full_spec((n, z_dim)), _full_spec((n, z_dim))],
        ),
        compiler_params=pltpu.CompilerParams(
            dimension_semantics=("arbitrary",),
        ),
    )(*inputs)

    # PyTorch fc_mu / fc_var are 1x1 convs on a 1x1 map -> (N, z, 1, 1).
    return mu.reshape(n, z_dim, 1, 1), var.reshape(n, z_dim, 1, 1)


# --------------------------------------------------------------------------- #
# Pure-JAX reference (mirrors the PyTorch module exactly)
# --------------------------------------------------------------------------- #
def _reference_forward(x, params):
    (w1, b1, w2, b2, w3, b3, wmu, bmu, wvar, bvar) = params
    dn = ("NCHW", "OIHW", "NCHW")

    def conv(h, w, b):
        return jax.lax.conv_general_dilated(h, w, (1, 1), "VALID",
                                            dimension_numbers=dn) + b.reshape(1, -1, 1, 1)

    h = jax.nn.elu(conv(x, w1, b1))
    h = jax.nn.elu(conv(h, w2, b2))
    h = jax.nn.elu(conv(h, w3, b3))
    mu = conv(h, wmu, bmu)
    var = jax.nn.softplus(conv(h, wvar, bvar))
    return mu, var


if __name__ == "__main__":
    key = jax.random.PRNGKey(0)
    N, hidden_dim, z_dim = 2, 32, 8
    ks = jax.random.split(key, 6)

    x = jax.random.normal(ks[0], (N, 1, 7, 7), dtype=jnp.float32)

    def init_conv(k, c_out, c_in, ksz):
        kw_, kb_ = jax.random.split(k)
        scale = 1.0 / np.sqrt(c_in * ksz * ksz)
        w = jax.random.uniform(kw_, (c_out, c_in, ksz, ksz), jnp.float32, -scale, scale)
        b = jax.random.uniform(kb_, (c_out,), jnp.float32, -scale, scale)
        return w, b

    w1, b1 = init_conv(ks[1], hidden_dim, 1, 3)
    w2, b2 = init_conv(ks[2], 2 * hidden_dim, hidden_dim, 3)
    w3, b3 = init_conv(ks[3], 2 * hidden_dim, 2 * hidden_dim, 3)
    wmu, bmu = init_conv(ks[4], z_dim, 2 * hidden_dim, 1)
    wvar, bvar = init_conv(ks[5], z_dim, 2 * hidden_dim, 1)
    params = (w1, b1, w2, b2, w3, b3, wmu, bmu, wvar, bvar)

    z_mu, z_var = encoder7x7_forward(x, params)
    (z_mu, z_var) = jax.block_until_ready((z_mu, z_var))

    ref_mu, ref_var = _reference_forward(x, params)

    assert z_mu.shape == (N, z_dim, 1, 1) and z_var.shape == (N, z_dim, 1, 1), (z_mu.shape, z_var.shape)
    # Loose-ish tolerance: MXU f32 matmuls at default precision vs. XLA conv.
    assert jnp.allclose(z_mu, ref_mu, rtol=5e-2, atol=5e-2), float(jnp.max(jnp.abs(z_mu - ref_mu)))
    assert jnp.allclose(z_var, ref_var, rtol=5e-2, atol=5e-2), float(jnp.max(jnp.abs(z_var - ref_var)))
    assert bool(jnp.all(z_var > 0.0)), "softplus output must be positive"

    print("KERNEL_OK")
</pallas_src>

<mosaic_0001>
module attributes {stable_mosaic.version = 11 : i64} {
  func.func @_encoder7x7_kernel(%arg0: i32, %arg1: memref<14x7xf32, #tpu.memory_space<vmem>>, %arg2: memref<3x10x14xf32, #tpu.memory_space<vmem>>, %arg3: memref<3x7x160xf32, #tpu.memory_space<vmem>>, %arg4: memref<1x160xf32, #tpu.memory_space<vmem>>, %arg5: memref<3x6x10xf32, #tpu.memory_space<vmem>>, %arg6: memref<3x160x192xf32, #tpu.memory_space<vmem>>, %arg7: memref<1x192xf32, #tpu.memory_space<vmem>>, %arg8: memref<3x2x6xf32, #tpu.memory_space<vmem>>, %arg9: memref<3x192x64xf32, #tpu.memory_space<vmem>>, %arg10: memref<1x64xf32, #tpu.memory_space<vmem>>, %arg11: memref<64x8xf32, #tpu.memory_space<vmem>>, %arg12: memref<1x8xf32, #tpu.memory_space<vmem>>, %arg13: memref<64x8xf32, #tpu.memory_space<vmem>>, %arg14: memref<1x8xf32, #tpu.memory_space<vmem>>, %arg15: memref<2x8xf32, #tpu.memory_space<vmem>>, %arg16: memref<2x8xf32, #tpu.memory_space<vmem>>) attributes {dimension_semantics = [#tpu.dimension_semantics<arbitrary>], iteration_bounds = array<i64: 1>, scalar_prefetch = 0 : i64, scratch_operands = 0 : i64, tpu.core_type = #tpu.core_type<tc>, window_params = [{pipeline_mode = #tpu.pipeline_mode<synchronous>, transform_indices = @transform_0, window_bounds = array<i64: 14, 7>}, {pipeline_mode = #tpu.pipeline_mode<synchronous>, transform_indices = @transform_1, window_bounds = array<i64: 3, 10, 14>}, {pipeline_mode = #tpu.pipeline_mode<synchronous>, transform_indices = @transform_2, window_bounds = array<i64: 3, 7, 160>}, {pipeline_mode = #tpu.pipeline_mode<synchronous>, transform_indices = @transform_3, window_bounds = array<i64: 1, 160>}, {pipeline_mode = #tpu.pipeline_mode<synchronous>, transform_indices = @transform_4, window_bounds = array<i64: 3, 6, 10>}, {pipeline_mode = #tpu.pipeline_mode<synchronous>, transform_indices = @transform_5, window_bounds = array<i64: 3, 160, 192>}, {pipeline_mode = #tpu.pipeline_mode<synchronous>, transform_indices = @transform_6, window_bounds = array<i64: 1, 192>}, {pipeline_mode = #tpu.pipeline_mode<synchronous>, transform_indices = @transform_7, window_bounds = array<i64: 3, 2, 6>}, {pipeline_mode = #tpu.pipeline_mode<synchronous>, transform_indices = @transform_8, window_bounds = array<i64: 3, 192, 64>}, {pipeline_mode = #tpu.pipeline_mode<synchronous>, transform_indices = @transform_9, window_bounds = array<i64: 1, 64>}, {pipeline_mode = #tpu.pipeline_mode<synchronous>, transform_indices = @transform_10, window_bounds = array<i64: 64, 8>}, {pipeline_mode = #tpu.pipeline_mode<synchronous>, transform_indices = @transform_11, window_bounds = array<i64: 1, 8>}, {pipeline_mode = #tpu.pipeline_mode<synchronous>, transform_indices = @transform_12, window_bounds = array<i64: 64, 8>}, {pipeline_mode = #tpu.pipeline_mode<synchronous>, transform_indices = @transform_13, window_bounds = array<i64: 1, 8>}, {pipeline_mode = #tpu.pipeline_mode<synchronous>, transform_indices = @transform_14, window_bounds = array<i64: 2, 8>}, {pipeline_mode = #tpu.pipeline_mode<synchronous>, transform_indices = @transform_15, window_bounds = array<i64: 2, 8>}]} {
    %c0 = arith.constant 0 : index
    %c0_0 = arith.constant 0 : index
    %0 = vector.load %arg1[%c0, %c0_0] : memref<14x7xf32, #tpu.memory_space<vmem>>, vector<14x7xf32>
    %c0_1 = arith.constant 0 : index
    %c0_2 = arith.constant 0 : index
    %c0_3 = arith.constant 0 : index
    %1 = vector.load %arg2[%c0_1, %c0_2, %c0_3] : memref<3x10x14xf32, #tpu.memory_space<vmem>>, vector<1x10x14xf32>
    %2 = vector.shape_cast %1 : vector<1x10x14xf32> to vector<10x14xf32>
    %cst = arith.constant dense<0.000000e+00> : vector<10x7xf32>
    %3 = tpu.matmul %2, %0, %cst {dimension_numbers = #tpu.dot_dimension_numbers<[1], [0], [0], [1], [0, 0, 1, 1], [], []>} : vector<10x14xf32>, vector<14x7xf32>, vector<10x7xf32> -> vector<10x7xf32>
    %c0_4 = arith.constant 0 : index
    %c0_5 = arith.constant 0 : index
    %c0_6 = arith.constant 0 : index
    %4 = vector.load %arg3[%c0_4, %c0_5, %c0_6] : memref<3x7x160xf32, #tpu.memory_space<vmem>>, vector<1x7x160xf32>
    %5 = vector.shape_cast %4 : vector<1x7x160xf32> to vector<7x160xf32>
    %cst_7 = arith.constant dense<0.000000e+00> : vector<10x160xf32>
    %6 = tpu.matmul %3, %5, %cst_7 {dimension_numbers = #tpu.dot_dimension_numbers<[1], [0], [0], [1], [0, 0, 1, 1], [], []>} : vector<10x7xf32>, vector<7x160xf32>, vector<10x160xf32> -> vector<10x160xf32>
    %c1 = arith.constant 1 : index
    %c0_8 = arith.constant 0 : index
    %c0_9 = arith.constant 0 : index
    %7 = vector.load %arg2[%c1, %c0_8, %c0_9] : memref<3x10x14xf32, #tpu.memory_space<vmem>>, vector<1x10x14xf32>
    %8 = vector.shape_cast %7 : vector<1x10x14xf32> to vector<10x14xf32>
    %cst_10 = arith.constant dense<0.000000e+00> : vector<10x7xf32>
    %9 = tpu.matmul %8, %0, %cst_10 {dimension_numbers = #tpu.dot_dimension_numbers<[1], [0], [0], [1], [0, 0, 1, 1], [], []>} : vector<10x14xf32>, vector<14x7xf32>, vector<10x7xf32> -> vector<10x7xf32>
    %c1_11 = arith.constant 1 : index
    %c0_12 = arith.constant 0 : index
    %c0_13 = arith.constant 0 : index
    %10 = vector.load %arg3[%c1_11, %c0_12, %c0_13] : memref<3x7x160xf32, #tpu.memory_space<vmem>>, vector<1x7x160xf32>
    %11 = vector.shape_cast %10 : vector<1x7x160xf32> to vector<7x160xf32>
    %cst_14 = arith.constant dense<0.000000e+00> : vector<10x160xf32>
    %12 = tpu.matmul %9, %11, %cst_14 {dimension_numbers = #tpu.dot_dimension_numbers<[1], [0], [0], [1], [0, 0, 1, 1], [], []>} : vector<10x7xf32>, vector<7x160xf32>, vector<10x160xf32> -> vector<10x160xf32>
    %13 = arith.addf %6, %12 : vector<10x160xf32>
    %c2 = arith.constant 2 : index
    %c0_15 = arith.constant 0 : index
    %c0_16 = arith.constant 0 : index
    %14 = vector.load %arg2[%c2, %c0_15, %c0_16] : memref<3x10x14xf32, #tpu.memory_space<vmem>>, vector<1x10x14xf32>
    %15 = vector.shape_cast %14 : vector<1x10x14xf32> to vector<10x14xf32>
    %cst_17 = arith.constant dense<0.000000e+00> : vector<10x7xf32>
    %16 = tpu.matmul %15, %0, %cst_17 {dimension_numbers = #tpu.dot_dimension_numbers<[1], [0], [0], [1], [0, 0, 1, 1], [], []>} : vector<10x14xf32>, vector<14x7xf32>, vector<10x7xf32> -> vector<10x7xf32>
    %c2_18 = arith.constant 2 : index
    %c0_19 = arith.constant 0 : index
    %c0_20 = arith.constant 0 : index
    %17 = vector.load %arg3[%c2_18, %c0_19, %c0_20] : memref<3x7x160xf32, #tpu.memory_space<vmem>>, vector<1x7x160xf32>
    %18 = vector.shape_cast %17 : vector<1x7x160xf32> to vector<7x160xf32>
    %cst_21 = arith.constant dense<0.000000e+00> : vector<10x160xf32>
    %19 = tpu.matmul %16, %18, %cst_21 {dimension_numbers = #tpu.dot_dimension_numbers<[1], [0], [0], [1], [0, 0, 1, 1], [], []>} : vector<10x7xf32>, vector<7x160xf32>, vector<10x160xf32> -> vector<10x160xf32>
    %20 = arith.addf %13, %19 : vector<10x160xf32>
    %c0_22 = arith.constant 0 : index
    %c0_23 = arith.constant 0 : index
    %21 = vector.load %arg4[%c0_22, %c0_23] : memref<1x160xf32, #tpu.memory_space<vmem>>, vector<1x160xf32>
    %22 = vector.broadcast %21 : vector<1x160xf32> to vector<10x160xf32>
    %23 = arith.addf %20, %22 : vector<10x160xf32>
    %cst_24 = arith.constant 0.000000e+00 : f32
    %24 = vector.broadcast %cst_24 : f32 to vector<10x160xf32>
    %25 = arith.cmpf ogt, %23, %24 : vector<10x160xf32>
    %cst_25 = arith.constant 0.000000e+00 : f32
    %26 = vector.broadcast %cst_25 : f32 to vector<10x160xf32>
    %27 = arith.minimumf %23, %26 : vector<10x160xf32>
    %28 = math.exp %27 : vector<10x160xf32>
    %cst_26 = arith.constant 1.000000e+00 : f32
    %29 = vector.broadcast %cst_26 : f32 to vector<10x160xf32>
    %30 = arith.subf %28, %29 : vector<10x160xf32>
    %31 = arith.select %25, %23, %30 : vector<10x160xi1>, vector<10x160xf32>
    %c0_27 = arith.constant 0 : index
    %c0_28 = arith.constant 0 : index
    %c0_29 = arith.constant 0 : index
    %32 = vector.load %arg5[%c0_27, %c0_28, %c0_29] : memref<3x6x10xf32, #tpu.memory_space<vmem>>, vector<1x6x10xf32>
    %33 = vector.shape_cast %32 : vector<1x6x10xf32> to vector<6x10xf32>
    %cst_30 = arith.constant dense<0.000000e+00> : vector<6x160xf32>
    %34 = tpu.matmul %33, %31, %cst_30 {dimension_numbers = #tpu.dot_dimension_numbers<[1], [0], [0], [1], [0, 0, 1, 1], [], []>} : vector<6x10xf32>, vector<10x160xf32>, vector<6x160xf32> -> vector<6x160xf32>
    %c0_31 = arith.constant 0 : index
    %c0_32 = arith.constant 0 : index
    %c0_33 = arith.constant 0 : index
    %35 = vector.load %arg6[%c0_31, %c0_32, %c0_33] : memref<3x160x192xf32, #tpu.memory_space<vmem>>, vector<1x160x192xf32>
    %36 = vector.shape_cast %35 : vector<1x160x192xf32> to vector<160x192xf32>
    %cst_34 = arith.constant dense<0.000000e+00> : vector<6x192xf32>
    %37 = tpu.matmul %34, %36, %cst_34 {dimension_numbers = #tpu.dot_dimension_numbers<[1], [0], [0], [1], [0, 0, 1, 1], [], []>} : vector<6x160xf32>, vector<160x192xf32>, vector<6x192xf32> -> vector<6x192xf32>
    %c1_35 = arith.constant 1 : index
    %c0_36 = arith.constant 0 : index
    %c0_37 = arith.constant 0 : index
    %38 = vector.load %arg5[%c1_35, %c0_36, %c0_37] : memref<3x6x10xf32, #tpu.memory_space<vmem>>, vector<1x6x10xf32>
    %39 = vector.shape_cast %38 : vector<1x6x10xf32> to vector<6x10xf32>
    %cst_38 = arith.constant dense<0.000000e+00> : vector<6x160xf32>
    %40 = tpu.matmul %39, %31, %cst_38 {dimension_numbers = #tpu.dot_dimension_numbers<[1], [0], [0], [1], [0, 0, 1, 1], [], []>} : vector<6x10xf32>, vector<10x160xf32>, vector<6x160xf32> -> vector<6x160xf32>
    %c1_39 = arith.constant 1 : index
    %c0_40 = arith.constant 0 : index
    %c0_41 = arith.constant 0 : index
    %41 = vector.load %arg6[%c1_39, %c0_40, %c0_41] : memref<3x160x192xf32, #tpu.memory_space<vmem>>, vector<1x160x192xf32>
    %42 = vector.shape_cast %41 : vector<1x160x192xf32> to vector<160x192xf32>
    %cst_42 = arith.constant dense<0.000000e+00> : vector<6x192xf32>
    %43 = tpu.matmul %40, %42, %cst_42 {dimension_numbers = #tpu.dot_dimension_numbers<[1], [0], [0], [1], [0, 0, 1, 1], [], []>} : vector<6x160xf32>, vector<160x192xf32>, vector<6x192xf32> -> vector<6x192xf32>
    %44 = arith.addf %37, %43 : vector<6x192xf32>
    %c2_43 = arith.constant 2 : index
    %c0_44 = arith.constant 0 : index
    %c0_45 = arith.constant 0 : index
    %45 = vector.load %arg5[%c2_43, %c0_44, %c0_45] : memref<3x6x10xf32, #tpu.memory_space<vmem>>, vector<1x6x10xf32>
    %46 = vector.shape_cast %45 : vector<1x6x10xf32> to vector<6x10xf32>
    %cst_46 = arith.constant dense<0.000000e+00> : vector<6x160xf32>
    %47 = tpu.matmul %46, %31, %cst_46 {dimension_numbers = #tpu.dot_dimension_numbers<[1], [0], [0], [1], [0, 0, 1, 1], [], []>} : vector<6x10xf32>, vector<10x160xf32>, vector<6x160xf32> -> vector<6x160xf32>
    %c2_47 = arith.constant 2 : index
    %c0_48 = arith.constant 0 : index
    %c0_49 = arith.constant 0 : index
    %48 = vector.load %arg6[%c2_47, %c0_48, %c0_49] : memref<3x160x192xf32, #tpu.memory_space<vmem>>, vector<1x160x192xf32>
    %49 = vector.shape_cast %48 : vector<1x160x192xf32> to vector<160x192xf32>
    %cst_50 = arith.constant dense<0.000000e+00> : vector<6x192xf32>
    %50 = tpu.matmul %47, %49, %cst_50 {dimension_numbers = #tpu.dot_dimension_numbers<[1], [0], [0], [1], [0, 0, 1, 1], [], []>} : vector<6x160xf32>, vector<160x192xf32>, vector<6x192xf32> -> vector<6x192xf32>
    %51 = arith.addf %44, %50 : vector<6x192xf32>
    %c0_51 = arith.constant 0 : index
    %c0_52 = arith.constant 0 : index
    %52 = vector.load %arg7[%c0_51, %c0_52] : memref<1x192xf32, #tpu.memory_space<vmem>>, vector<1x192xf32>
    %53 = vector.broadcast %52 : vector<1x192xf32> to vector<6x192xf32>
    %54 = arith.addf %51, %53 : vector<6x192xf32>
    %cst_53 = arith.constant 0.000000e+00 : f32
    %55 = vector.broadcast %cst_53 : f32 to vector<6x192xf32>
    %56 = arith.cmpf ogt, %54, %55 : vector<6x192xf32>
    %cst_54 = arith.constant 0.000000e+00 : f32
    %57 = vector.broadcast %cst_54 : f32 to vector<6x192xf32>
    %58 = arith.minimumf %54, %57 : vector<6x192xf32>
    %59 = math.exp %58 : vector<6x192xf32>
    %cst_55 = arith.constant 1.000000e+00 : f32
    %60 = vector.broadcast %cst_55 : f32 to vector<6x192xf32>
    %61 = arith.subf %59, %60 : vector<6x192xf32>
    %62 = arith.select %56, %54, %61 : vector<6x192xi1>, vector<6x192xf32>
    %c0_56 = arith.constant 0 : index
    %c0_57 = arith.constant 0 : index
    %c0_58 = arith.constant 0 : index
    %63 = vector.load %arg8[%c0_56, %c0_57, %c0_58] : memref<3x2x6xf32, #tpu.memory_space<vmem>>, vector<1x2x6xf32>
    %64 = vector.shape_cast %63 : vector<1x2x6xf32> to vector<2x6xf32>
    %cst_59 = arith.constant dense<0.000000e+00> : vector<2x192xf32>
    %65 = tpu.matmul %64, %62, %cst_59 {dimension_numbers = #tpu.dot_dimension_numbers<[1], [0], [0], [1], [0, 0, 1, 1], [], []>} : vector<2x6xf32>, vector<6x192xf32>, vector<2x192xf32> -> vector<2x192xf32>
    %c0_60 = arith.constant 0 : index
    %c0_61 = arith.constant 0 : index
    %c0_62 = arith.constant 0 : index
    %66 = vector.load %arg9[%c0_60, %c0_61, %c0_62] : memref<3x192x64xf32, #tpu.memory_space<vmem>>, vector<1x192x64xf32>
    %67 = vector.shape_cast %66 : vector<1x192x64xf32> to vector<192x64xf32>
    %cst_63 = arith.constant dense<0.000000e+00> : vector<2x64xf32>
    %68 = tpu.matmul %65, %67, %cst_63 {dimension_numbers = #tpu.dot_dimension_numbers<[1], [0], [0], [1], [0, 0, 1, 1], [], []>} : vector<2x192xf32>, vector<192x64xf32>, vector<2x64xf32> -> vector<2x64xf32>
    %c1_64 = arith.constant 1 : index
    %c0_65 = arith.constant 0 : index
    %c0_66 = arith.constant 0 : index
    %69 = vector.load %arg8[%c1_64, %c0_65, %c0_66] : memref<3x2x6xf32, #tpu.memory_space<vmem>>, vector<1x2x6xf32>
    %70 = vector.shape_cast %69 : vector<1x2x6xf32> to vector<2x6xf32>
    %cst_67 = arith.constant dense<0.000000e+00> : vector<2x192xf32>
    %71 = tpu.matmul %70, %62, %cst_67 {dimension_numbers = #tpu.dot_dimension_numbers<[1], [0], [0], [1], [0, 0, 1, 1], [], []>} : vector<2x6xf32>, vector<6x192xf32>, vector<2x192xf32> -> vector<2x192xf32>
    %c1_68 = arith.constant 1 : index
    %c0_69 = arith.constant 0 : index
    %c0_70 = arith.constant 0 : index
    %72 = vector.load %arg9[%c1_68, %c0_69, %c0_70] : memref<3x192x64xf32, #tpu.memory_space<vmem>>, vector<1x192x64xf32>
    %73 = vector.shape_cast %72 : vector<1x192x64xf32> to vector<192x64xf32>
    %cst_71 = arith.constant dense<0.000000e+00> : vector<2x64xf32>
    %74 = tpu.matmul %71, %73, %cst_71 {dimension_numbers = #tpu.dot_dimension_numbers<[1], [0], [0], [1], [0, 0, 1, 1], [], []>} : vector<2x192xf32>, vector<192x64xf32>, vector<2x64xf32> -> vector<2x64xf32>
    %75 = arith.addf %68, %74 : vector<2x64xf32>
    %c2_72 = arith.constant 2 : index
    %c0_73 = arith.constant 0 : index
    %c0_74 = arith.constant 0 : index
    %76 = vector.load %arg8[%c2_72, %c0_73, %c0_74] : memref<3x2x6xf32, #tpu.memory_space<vmem>>, vector<1x2x6xf32>
    %77 = vector.shape_cast %76 : vector<1x2x6xf32> to vector<2x6xf32>
    %cst_75 = arith.constant dense<0.000000e+00> : vector<2x192xf32>
    %78 = tpu.matmul %77, %62, %cst_75 {dimension_numbers = #tpu.dot_dimension_numbers<[1], [0], [0], [1], [0, 0, 1, 1], [], []>} : vector<2x6xf32>, vector<6x192xf32>, vector<2x192xf32> -> vector<2x192xf32>
    %c2_76 = arith.constant 2 : index
    %c0_77 = arith.constant 0 : index
    %c0_78 = arith.constant 0 : index
    %79 = vector.load %arg9[%c2_76, %c0_77, %c0_78] : memref<3x192x64xf32, #tpu.memory_space<vmem>>, vector<1x192x64xf32>
    %80 = vector.shape_cast %79 : vector<1x192x64xf32> to vector<192x64xf32>
    %cst_79 = arith.constant dense<0.000000e+00> : vector<2x64xf32>
    %81 = tpu.matmul %78, %80, %cst_79 {dimension_numbers = #tpu.dot_dimension_numbers<[1], [0], [0], [1], [0, 0, 1, 1], [], []>} : vector<2x192xf32>, vector<192x64xf32>, vector<2x64xf32> -> vector<2x64xf32>
    %82 = arith.addf %75, %81 : vector<2x64xf32>
    %c0_80 = arith.constant 0 : index
    %c0_81 = arith.constant 0 : index
    %83 = vector.load %arg10[%c0_80, %c0_81] : memref<1x64xf32, #tpu.memory_space<vmem>>, vector<1x64xf32>
    %84 = vector.broadcast %83 : vector<1x64xf32> to vector<2x64xf32>
    %85 = arith.addf %82, %84 : vector<2x64xf32>
    %cst_82 = arith.constant 0.000000e+00 : f32
    %86 = vector.broadcast %cst_82 : f32 to vector<2x64xf32>
    %87 = arith.cmpf ogt, %85, %86 : vector<2x64xf32>
    %cst_83 = arith.constant 0.000000e+00 : f32
    %88 = vector.broadcast %cst_83 : f32 to vector<2x64xf32>
    %89 = arith.minimumf %85, %88 : vector<2x64xf32>
    %90 = math.exp %89 : vector<2x64xf32>
    %cst_84 = arith.constant 1.000000e+00 : f32
    %91 = vector.broadcast %cst_84 : f32 to vector<2x64xf32>
    %92 = arith.subf %90, %91 : vector<2x64xf32>
    %93 = arith.select %87, %85, %92 : vector<2x64xi1>, vector<2x64xf32>
    %c0_85 = arith.constant 0 : index
    %c0_86 = arith.constant 0 : index
    %94 = vector.load %arg11[%c0_85, %c0_86] : memref<64x8xf32, #tpu.memory_space<vmem>>, vector<64x8xf32>
    %cst_87 = arith.constant dense<0.000000e+00> : vector<2x8xf32>
    %95 = tpu.matmul %93, %94, %cst_87 {dimension_numbers = #tpu.dot_dimension_numbers<[1], [0], [0], [1], [0, 0, 1, 1], [], []>} : vector<2x64xf32>, vector<64x8xf32>, vector<2x8xf32> -> vector<2x8xf32>
    %c0_88 = arith.constant 0 : index
    %c0_89 = arith.constant 0 : index
    %96 = vector.load %arg12[%c0_88, %c0_89] : memref<1x8xf32, #tpu.memory_space<vmem>>, vector<1x8xf32>
    %97 = vector.broadcast %96 : vector<1x8xf32> to vector<2x8xf32>
    %98 = arith.addf %95, %97 : vector<2x8xf32>
    %c0_90 = arith.constant 0 : index
    %c0_91 = arith.constant 0 : index
    %99 = vector.load %arg13[%c0_90, %c0_91] : memref<64x8xf32, #tpu.memory_space<vmem>>, vector<64x8xf32>
    %cst_92 = arith.constant dense<0.000000e+00> : vector<2x8xf32>
    %100 = tpu.matmul %93, %99, %cst_92 {dimension_numbers = #tpu.dot_dimension_numbers<[1], [0], [0], [1], [0, 0, 1, 1], [], []>} : vector<2x64xf32>, vector<64x8xf32>, vector<2x8xf32> -> vector<2x8xf32>
    %c0_93 = arith.constant 0 : index
    %c0_94 = arith.constant 0 : index
    %101 = vector.load %arg14[%c0_93, %c0_94] : memref<1x8xf32, #tpu.memory_space<vmem>>, vector<1x8xf32>
    %102 = vector.broadcast %101 : vector<1x8xf32> to vector<2x8xf32>
    %103 = arith.addf %100, %102 : vector<2x8xf32>
    %cst_95 = arith.constant 0.000000e+00 : f32
    %104 = vector.broadcast %cst_95 : f32 to vector<2x8xf32>
    %105 = arith.maximumf %103, %104 : vector<2x8xf32>
    %106 = math.absf %103 : vector<2x8xf32>
    %cst_96 = arith.constant 0.000000e+00 : f32
    %107 = vector.broadcast %cst_96 : f32 to vector<2x8xf32>
    %108 = arith.subf %107, %106 : vector<2x8xf32>
    %109 = math.exp %108 : vector<2x8xf32>
    %cst_97 = arith.constant 1.000000e+00 : f32
    %110 = vector.broadcast %cst_97 : f32 to vector<2x8xf32>
    %111 = arith.addf %110, %109 : vector<2x8xf32>
    %112 = math.log %111 : vector<2x8xf32>
    %113 = arith.addf %105, %112 : vector<2x8xf32>
    %c0_98 = arith.constant 0 : index
    %c0_99 = arith.constant 0 : index
    %114 = vector.load %arg15[%c0_98, %c0_99] : memref<2x8xf32, #tpu.memory_space<vmem>>, vector<2x8xf32>
    tpu.vector_store %arg15[%c0_98, %c0_99], %98 {strides = array<i32>} : memref<2x8xf32, #tpu.memory_space<vmem>>, vector<2x8xf32>,
    %c0_100 = arith.constant 0 : index
    %c0_101 = arith.constant 0 : index
    %115 = vector.load %arg16[%c0_100, %c0_101] : memref<2x8xf32, #tpu.memory_space<vmem>>, vector<2x8xf32>
    tpu.vector_store %arg16[%c0_100, %c0_101], %113 {strides = array<i32>} : memref<2x8xf32, #tpu.memory_space<vmem>>, vector<2x8xf32>,
    return
  }
  func.func @transform_0(%arg0: i32) -> (i32, i32) {
    %c0_i32 = arith.constant 0 : i32
    %c0_i32_0 = arith.constant 0 : i32
    %c0_i32_1 = arith.constant 0 : i32
    return %c0_i32, %c0_i32_0 : i32, i32
  }
  func.func @transform_1(%arg0: i32) -> (i32, i32, i32) {
    %c0_i32 = arith.constant 0 : i32
    %c0_i32_0 = arith.constant 0 : i32
    %c0_i32_1 = arith.constant 0 : i32
    %c0_i32_2 = arith.constant 0 : i32
    return %c0_i32, %c0_i32_0, %c0_i32_1 : i32, i32, i32
  }
  func.func @transform_2(%arg0: i32) -> (i32, i32, i32) {
    %c0_i32 = arith.constant 0 : i32
    %c0_i32_0 = arith.constant 0 : i32
    %c0_i32_1 = arith.constant 0 : i32
    %c0_i32_2 = arith.constant 0 : i32
    return %c0_i32, %c0_i32_0, %c0_i32_1 : i32, i32, i32
  }
  func.func @transform_3(%arg0: i32) -> (i32, i32) {
    %c0_i32 = arith.constant 0 : i32
    %c0_i32_0 = arith.constant 0 : i32
    %c0_i32_1 = arith.constant 0 : i32
    return %c0_i32, %c0_i32_0 : i32, i32
  }
  func.func @transform_4(%arg0: i32) -> (i32, i32, i32) {
    %c0_i32 = arith.constant 0 : i32
    %c0_i32_0 = arith.constant 0 : i32
    %c0_i32_1 = arith.constant 0 : i32
    %c0_i32_2 = arith.constant 0 : i32
    return %c0_i32, %c0_i32_0, %c0_i32_1 : i32, i32, i32
  }
  func.func @transform_5(%arg0: i32) -> (i32, i32, i32) {
    %c0_i32 = arith.constant 0 : i32
    %c0_i32_0 = arith.constant 0 : i32
    %c0_i32_1 = arith.constant 0 : i32
    %c0_i32_2 = arith.constant 0 : i32
    return %c0_i32, %c0_i32_0, %c0_i32_1 : i32, i32, i32
  }
  func.func @transform_6(%arg0: i32) -> (i32, i32) {
    %c0_i32 = arith.constant 0 : i32
    %c0_i32_0 = arith.constant 0 : i32
    %c0_i32_1 = arith.constant 0 : i32
    return %c0_i32, %c0_i32_0 : i32, i32
  }
  func.func @transform_7(%arg0: i32) -> (i32, i32, i32) {
    %c0_i32 = arith.constant 0 : i32
    %c0_i32_0 = arith.constant 0 : i32
    %c0_i32_1 = arith.constant 0 : i32
    %c0_i32_2 = arith.constant 0 : i32
    return %c0_i32, %c0_i32_0, %c0_i32_1 : i32, i32, i32
  }
  func.func @transform_8(%arg0: i32) -> (i32, i32, i32) {
    %c0_i32 = arith.constant 0 : i32
    %c0_i32_0 = arith.constant 0 : i32
    %c0_i32_1 = arith.constant 0 : i32
    %c0_i32_2 = arith.constant 0 : i32
    return %c0_i32, %c0_i32_0, %c0_i32_1 : i32, i32, i32
  }
  func.func @transform_9(%arg0: i32) -> (i32, i32) {
    %c0_i32 = arith.constant 0 : i32
    %c0_i32_0 = arith.constant 0 : i32
    %c0_i32_1 = arith.constant 0 : i32
    return %c0_i32, %c0_i32_0 : i32, i32
  }
  func.func @transform_10(%arg0: i32) -> (i32, i32) {
    %c0_i32 = arith.constant 0 : i32
    %c0_i32_0 = arith.constant 0 : i32
    %c0_i32_1 = arith.constant 0 : i32
    return %c0_i32, %c0_i32_0 : i32, i32
  }
  func.func @transform_11(%arg0: i32) -> (i32, i32) {
    %c0_i32 = arith.constant 0 : i32
    %c0_i32_0 = arith.constant 0 : i32
    %c0_i32_1 = arith.constant 0 : i32
    return %c0_i32, %c0_i32_0 : i32, i32
  }
  func.func @transform_12(%arg0: i32) -> (i32, i32) {
    %c0_i32 = arith.constant 0 : i32
    %c0_i32_0 = arith.constant 0 : i32
    %c0_i32_1 = arith.constant 0 : i32
    return %c0_i32, %c0_i32_0 : i32, i32
  }
  func.func @transform_13(%arg0: i32) -> (i32, i32) {
    %c0_i32 = arith.constant 0 : i32
    %c0_i32_0 = arith.constant 0 : i32
    %c0_i32_1 = arith.constant 0 : i32
    return %c0_i32, %c0_i32_0 : i32, i32
  }
  func.func @transform_14(%arg0: i32) -> (i32, i32) {
    %c0_i32 = arith.constant 0 : i32
    %c0_i32_0 = arith.constant 0 : i32
    %c0_i32_1 = arith.constant 0 : i32
    return %c0_i32, %c0_i32_0 : i32, i32
  }
  func.func @transform_15(%arg0: i32) -> (i32, i32) {
    %c0_i32 = arith.constant 0 : i32
    %c0_i32_0 = arith.constant 0 : i32
    %c0_i32_1 = arith.constant 0 : i32
    return %c0_i32, %c0_i32_0 : i32, i32
  }
}

</mosaic_0001>

<bundles_post_ra>
// kernel: tpu_custom_call.1
= control target key start
LH: loop header
LB: loop body
LE: loop exit
PB: predicated region body
PF: predicated region fallthrough
CT: control target
= control target key end

     0   :  { %21 = vsyncpa [#allocation3], 0  ;;  %vm62_vm0 = vcmask 1045504   ;;  %vm2652_vm1 = vmmov 1   ;;  %vm55_vm3 = vcmask 113664   ;;  %s3630_s0 = inlined_call_operand.vmem [shape: f32[14,7], index: 0, kind: input, shape index: {}]   ;;  %s3631_s1 = inlined_call_operand.vmem [shape: f32[3,10,14], index: 1, kind: input, shape index: {}]   ;;  %s3632_s2 = inlined_call_operand.vmem [shape: f32[3,7,160], index: 2, kind: input, shape index: {}]   ;;  %s3633_s3 = inlined_call_operand.vmem [shape: f32[1,160], index: 3, kind: input, shape index: {}]   ;;  %s3634_s4 = inlined_call_operand.vmem [shape: f32[3,6,10], index: 4, kind: input, shape index: {}]   ;;  %s3635_s5 = inlined_call_operand.vmem [shape: f32[3,160,192], index: 5, kind: input, shape index: {}]   ;;  %s3636_s6 = inlined_call_operand.vmem [shape: f32[1,192], index: 6, kind: input, shape index: {}]   ;;  %s3637_s7 = inlined_call_operand.vmem [shape: f32[3,2,6], index: 7, kind: input, shape index: {}]   ;;  %s3638_s8 = inlined_call_operand.vmem [shape: f32[3,192,64], index: 8, kind: input, shape index: {}]   ;;  %s3639_s9 = inlined_call_operand.vmem [shape: f32[1,64], index: 9, kind: input, shape index: {}]   ;;  %s3640_s10 = inlined_call_operand.vmem [shape: f32[64,8], index: 10, kind: input, shape index: {}]   ;;  %s3641_s11 = inlined_call_operand.vmem [shape: f32[1,8], index: 11, kind: input, shape index: {}]   ;;  %s3642_s12 = inlined_call_operand.vmem [shape: f32[64,8], index: 12, kind: input, shape index: {}]   ;;  %s3643_s13 = inlined_call_operand.vmem [shape: f32[1,8], index: 13, kind: input, shape index: {}]   ;;  %s3644_s14 = inlined_call_operand.hbm [shape: f32[2,8], index: 14, kind: output, shape index: {0}]   ;;  %s3645_s15 = inlined_call_operand.hbm [shape: f32[2,8], index: 15, kind: output, shape index: {1}]  }
   0x1   :  { %v51_v0 = vld [vmem:[%s3630_s0] sm:$0xff]  ;;  %v52_v1 = vld [vmem:[%s3630_s0 + $0x8] sm:$0x3f]  ;;  %vm2749_vm2 = vmpackc.low %vm62_vm0, %vm2652_vm1 }
   0x2   :  { %v53_v2 = vld [vmem:[%s3631_s1] sm:$0xff]  ;;  %v2280_v3 = vpack.c.bf16 %v52_v1, %v51_v0 }
   0x3   :  { %2225 = vmatprep.mubr.msk.f32.mxu0 %vm55_vm3, %v53_v2  ;;  %v2012_v5 = vld [vmem:[%s3631_s1 + $0x20] sm:$0xff] }
   0x4   :  { %2282 = vmatprep.subr.msk.bf16.mxu0 %vm2749_vm2, %v2280_v3  ;;  %2294 = vmatprep.subr.msk.bf16.mxu1 %vm2749_vm2, %v2280_v3 }
   0x5   :  { %22 = vsyncpa [#allocation5], 0  ;;  %2285 = vmatpush3.bf16.msk.msra.mxu0 %vm2749_vm2, %v2280_v3  ;;  %v54_v6 = vld [vmem:[%s3631_s1 + $0x8] sm:$0x3]  ;;  %2297 = vmatpush3.bf16.msk.msra.mxu1 %vm2749_vm2, %v2280_v3  ;;  %v1997_v8 = vld [vmem:[%s3631_s1 + $0x10] sm:$0xff]  ;;  %vm237_vm4 = vcmask 1046528   ;;  %v592_v23 = vlaneseq }
   0x6   :  { %v2013_v7 = vld [vmem:[%s3631_s1 + $0x28] sm:$0x3]  ;;  %2288 = vmatprep.subr.msk.bf16.mxu0 %vm2749_vm2, %v2280_v3  ;;  %2239 = vmatprep.mubr.msk.f32.mxu1 %vm55_vm3, %v2012_v5  ;;  %v1998_v9 = vld [vmem:[%s3631_s1 + $0x18] sm:$0x3]  ;;  %v2002_v11 = vld [vmem:[%s3632_s2 + $0x10] sm:$0x7f] }
   0x7   :  { %v2003_v10 = vld [vmem:[%s3632_s2 + $0x18] sm:$0x7f]  ;;  %v2653_v12 = vmov 0.0   ;;  %v142_v13 = vld [vmem:[%s3632_s2 + $0x8] sm:$0x7f]  ;;  %vm230_vm5 = vcmask 56320  }
   0x8   :  { %2226 = vmatmul.mubr.msk.f32.vlgmr.msra.gmra.mrb[0].mxu0 %vm55_vm3, %v54_v6  ;;  %2240 = vmatmul.mubr.msk.f32.vlgmr.msra.gmra.mrb[0].mxu1 %vm55_vm3, %v2013_v7  ;;  %v141_v19 = vld [vmem:[%s3632_s2] sm:$0x7f]  ;;  %v2018_v21 = vld [vmem:[%s3632_s2 + $0x28] sm:$0x7f]  ;;  %v2824_v24 = vshrl.u32 %v592_v23, 7  ;;  %vm635_vm6 = vcmask 1041408  }
   0x9   :  { %2291 = vmatpush3.bf16.msk.msra.mxu0 %vm2749_vm2, %v2280_v3  ;;  %2232 = vmatprep.mubr.msk.f32.mxu0 %vm55_vm3, %v1997_v8  ;;  %v2017_v22 = vld [vmem:[%s3632_s2 + $0x20] sm:$0x7f]  ;;  %vm2836_vm11 = vmpackc.low %vm635_vm6, %vm2652_vm1  ;;  %v2035_v61 = vld [vmem:[%s3635_s5 + $0x148] sm:$0xff]  ;;  %vm631_vm12 = vcmask 80896   ;;  %vm870_vm13 = vcmask 261120   ;;  %vm1239_vm1 = vcmask 48128  }
   0xa   :  { %2004 = vmatprep.subr.msk.mxu0 %vm237_vm4, %v2003_v10  ;;  %706 = vmatprep.mubr.f32.mxu1 %v2653_v12  ;;  %v594_v25 = vsub.s32 0, %v2824_v24  ;;  %v590_v26 = vld [vmem:[%s3633_s3] sm:$0x3]  ;;  %v598_v27 = vsub.s32 1, %v2824_v24  ;;  %v2037_v62 = vld [vmem:[%s3635_s5 + $0x158] sm:$0xff]  ;;  %v2036_v3 = vld [vmem:[%s3635_s5 + $0x150] sm:$0xff] }
   0xb   :  { %v630_v63 = vld [vmem:[%s3634_s4] sm:$0x3f]  ;;  %v2076_v0 = vld [vmem:[%s3634_s4 + $0x10] sm:$0x3f]  ;;  %v2310_v1 = vpack.c.bf16 %v2037_v62, %v2035_v61  ;;  %v2039_v4 = vld [vmem:[%s3635_s5 + $0x168] sm:$0xff]  ;;  %vm1445_vm2 = vcmask 523264  }
   0xc   :  { %2233 = vmatmul.mubr.msk.f32.vlgmr.msra.gmra.mrb[2].mxu0 %vm55_vm3, %v1998_v9  ;;  %v595_v28 = vrot.slane %v590_v26, %v594_v25  ;;  %v599_v29 = vrot.slane %v590_v26, %v598_v27  ;;  %v2034_v2 = vld [vmem:[%s3635_s5 + $0x140] sm:$0xff]  ;;  %v2041_v5 = vld [vmem:[%s3635_s5 + $0x178] sm:$0xff]  ;;  %v2030_v6 = vld [vmem:[%s3634_s4 + $0x8] sm:$0x3f]  ;;  %s2656_s21 = smov [#allocation2]  }
   0xd   :  { %2005 = vmatpush1.msk.msra.mxu0 %vm237_vm4, %v2002_v11  ;;  %308 = vmatprep.mubr.f32.mxu0 %v2653_v12  ;;  %v2312_v7 = vpack.c.bf16 %v2036_v3, %v2034_v2  ;;  %v2314_v8 = vpack.c.bf16 %v2041_v5, %v2039_v4  ;;  %v2038_v9 = vld [vmem:[%s3635_s5 + $0x160] sm:$0xff]  ;;  %v2040_v10 = vld [vmem:[%s3635_s5 + $0x170] sm:$0xff]  ;;  %v2043_v11 = vld [vmem:[%s3635_s5 + $0x188] sm:$0xff]  ;;  %s1972_s22 = sshll.u32 %s2656_s21, 4  ;;  %s1973_s22 = int_to_ptr.vmem [resolvable:$true] %s1972_s22 }
   0xe   :  { %2008 = vmatprep.subr.msk.mxu0 %vm237_vm4, %v142_v13  ;;  %v2045_v13 = vld [vmem:[%s3635_s5 + $0x198] sm:$0xff]  ;;  %v2048_v23 = vld [vmem:[%s3635_s5 + $0x1b0] sm:$0xff]  ;;  %v2051_v26 = vld [vmem:[%s3635_s5 + $0x1c8] sm:$0xff]  ;;  %p2609_p1 = scmp.lt.s32.totalorder %s1973_s22, %s1973_s22 }
   0xf   :  { %v2073_v59 = vld [vmem:[%s3635_s5 + $0x278] sm:$0xff]  ;;  %v2070_v61 = vld [vmem:[%s3635_s5 + $0x260] sm:$0xff]  ;;  %v2072_v62 = vld [vmem:[%s3635_s5 + $0x270] sm:$0xff] }
  0x10   :  { %v1238_v24 = vld [vmem:[%s3637_s7] sm:$0x3] }
  0xdb   :  { %v2227_v14 = vpop.f32.mrb[0].mxu0  ;;  %v2241_v15 = vpop.f32.mrb[0].mxu1 }
  0xdc   :  { %v132_v16 = vpop.f32.mrb[1].mxu0  ;;  %v485_v17 = vpop.f32.mrb[1].mxu1 }
  0xdf   :  { %v2234_v18 = vpop.f32.mrb[2].mxu0 }
  0xe0   :  { %v218_v20 = vpop.f32.mrb[3].mxu0 }
  0xe1   :  { %2006 = vmatmul.mubr.msk.f32.vlgmr.msra.gmra.mrb[4].mxu0 %vm230_vm5, %v218_v20 }
  0xe2   :  { %314 = vmatprep.mubr.f32.mxu0 %v2653_v12  ;;  %2009 = vmatpush1.msk.msra.mxu0 %vm237_vm4, %v141_v19  ;;  %v2049_v19 = vld [vmem:[%s3635_s5 + $0x1b8] sm:$0xff] }
  0xe3   :  { %2019 = vmatprep.subr.msk.mxu0 %vm237_vm4, %v2018_v21 }
  0xe5   :  { %2007 = vmatmul.mubr.msk.f32.gmra.mrb[6].mxu0 %vm230_vm5, %v2234_v18  ;;  %v2047_v18 = vld [vmem:[%s3635_s5 + $0x1a8] sm:$0xff] }
  0xe6   :  { %397 = vmatprep.mubr.f32.mxu0 %v2653_v12  ;;  %v2322_v21 = vpack.c.bf16 %v2049_v19, %v2047_v18  ;;  %v722_v18 = vld [vmem:[%s3635_s5 + $0x48] sm:$0xff]  ;;  %v724_v19 = vld [vmem:[%s3635_s5 + $0x58] sm:$0xff] }
  0xe9   :  { %2010 = vmatmul.mubr.msk.f32.vlgmr.msra.gmra.mrb[4].mxu0 %vm230_vm5, %v132_v16  ;;  %v2042_v16 = vld [vmem:[%s3635_s5 + $0x180] sm:$0xff] }
  0xea   :  { %403 = vmatprep.mubr.f32.mxu0 %v2653_v12  ;;  %2020 = vmatpush1.msk.msra.mxu0 %vm237_vm4, %v2017_v22  ;;  %v2046_v22 = vld [vmem:[%s3635_s5 + $0x1a0] sm:$0xff]  ;;  %vm1963_vm4 = vcmask 58368  }
  0xed   :  { %2011 = vmatmul.mubr.msk.f32.gmra.mrb[6].mxu0 %vm230_vm5, %v2227_v14  ;;  %v2316_v14 = vpack.c.bf16 %v2040_v10, %v2038_v9  ;;  %v718_v9 = vld [vmem:[%s3635_s5 + $0x28] sm:$0xff]  ;;  %v720_v10 = vld [vmem:[%s3635_s5 + $0x38] sm:$0xff] }
  0xee   :  { %573 = vmatprep.mubr.f32.mxu0 %v2653_v12 }
  0xf1   :  { %2021 = vmatmul.mubr.msk.f32.vlgmr.msra.gmra.mrb[4].mxu0 %vm230_vm5, %v485_v17  ;;  %v2044_v17 = vld [vmem:[%s3635_s5 + $0x190] sm:$0xff] }
  0xf2   :  { %579 = vmatprep.mubr.f32.mxu0 %v2653_v12  ;;  %v2320_v20 = vpack.c.bf16 %v2044_v17, %v2042_v16  ;;  %v717_v16 = vld [vmem:[%s3635_s5 + $0x20] sm:$0xff]  ;;  %v719_v17 = vld [vmem:[%s3635_s5 + $0x30] sm:$0xff] }
  0xf5   :  { %2022 = vmatmul.mubr.msk.f32.gmra.mrb[6].mxu0 %vm230_vm5, %v2241_v15  ;;  %v2318_v15 = vpack.c.bf16 %v2045_v13, %v2043_v11 }
  0xf6   :  { %1088 = vmatprep.mubr.f32.mxu0 %v2653_v12 }
 0x1c4   :  { %v575_v30 = vpop.f32.mrb[4].mxu0 }
 0x1c5   :  { %v602_v31 = vadd.f32 %v595_v28, %v575_v30  ;;  %v577_v32 = vpop.f32.mrb[5].mxu0 }
 0x1c6   :  { %v603_v33 = vadd.f32 %v599_v29, %v577_v32  ;;  %v2052_v32 = vld [vmem:[%s3635_s5 + $0x1d0] sm:$0xff] }
 0x1c7   :  { %v610_v34 = vmin.f32 %v602_v31, 0.0  ;;  %vm606_vm7 = vcmp.gt.f32.partialorder %v602_v31, 0.0 }
 0x1c8   :  { %v611_v35 = vmin.f32 %v603_v33, 0.0  ;;  %v581_v36 = vpop.f32.mrb[6].mxu0  ;;  %vm607_vm9 = vcmp.gt.f32.partialorder %v603_v33, 0.0 }
 0x1c9   :  { %v614_v37 = vmul.f32 1.442695, %v610_v34  ;;  %v604_v38 = vadd.f32 %v595_v28, %v581_v36  ;;  %v583_v39 = vpop.f32.mrb[7].mxu0  ;;  %v2053_v28 = vld [vmem:[%s3635_s5 + $0x1d8] sm:$0xff] }
 0x1ca   :  { %v616_v40 = vmul.f32 1.442695, %v611_v35  ;;  %v605_v41 = vadd.f32 %v599_v29, %v583_v39  ;;  %v2324_v29 = vpack.c.bf16 %v2048_v23, %v2046_v22  ;;  %v2326_v30 = vpack.c.bf16 %v2053_v28, %v2051_v26  ;;  %v2057_v34 = vld [vmem:[%s3635_s5 + $0x1f8] sm:$0xff]  ;;  %v2059_v39 = vld [vmem:[%s3635_s5 + $0x208] sm:$0xff]  ;;  %v721_v22 = vld [vmem:[%s3635_s5 + $0x40] sm:$0xff] }
 0x1cb   :  { %2586 = vpow2.f32 %v614_v37  ;;  %v612_v42 = vmin.f32 %v604_v38, 0.0  ;;  %vm608_vm8 = vcmp.gt.f32.partialorder %v604_v38, 0.0  ;;  %v2054_v37 = vld [vmem:[%s3635_s5 + $0x1e0] sm:$0xff]  ;;  %v723_v23 = vld [vmem:[%s3635_s5 + $0x50] sm:$0xff]  ;;  %v726_v26 = vld [vmem:[%s3635_s5 + $0x68] sm:$0xff] }
 0x1cc   :  { %2588 = vpow2.f32 %v616_v40  ;;  %v613_v43 = vmin.f32 %v605_v41, 0.0  ;;  %vm609_vm10 = vcmp.gt.f32.partialorder %v605_v41, 0.0  ;;  %v2061_v40 = vld [vmem:[%s3635_s5 + $0x218] sm:$0xff] }
 0x1cd   :  { %v618_v44 = vmul.f32 1.442695, %v612_v42  ;;  %v2334_v42 = vpack.c.bf16 %v2061_v40, %v2059_v39  ;;  %v728_v28 = vld [vmem:[%s3635_s5 + $0x78] sm:$0xff]  ;;  %v734_v39 = vld [vmem:[%s3635_s5 + $0xa8] sm:$0xff] }
 0x1ce   :  { %v620_v45 = vmul.f32 1.442695, %v613_v43  ;;  %v2058_v43 = vld [vmem:[%s3635_s5 + $0x200] sm:$0xff]  ;;  %v736_v40 = vld [vmem:[%s3635_s5 + $0xb8] sm:$0xff] }
 0x1cf   :  { %2590 = vpow2.f32 %v618_v44  ;;  %v2060_v44 = vld [vmem:[%s3635_s5 + $0x210] sm:$0xff] }
 0x1d0   :  { %2592 = vpow2.f32 %v620_v45  ;;  %v2063_v45 = vld [vmem:[%s3635_s5 + $0x228] sm:$0xff] }
 0x1d5   :  { %v2587_v46 = vpop.eup %2586 }
 0x1d6   :  { %v2589_v47 = vpop.eup %2588  ;;  %v2023_v48 = vadd.f32 -1.0, %v2587_v46  ;;  %v2065_v46 = vld [vmem:[%s3635_s5 + $0x238] sm:$0xff] }
 0x1d7   :  { %v2024_v50 = vadd.f32 -1.0, %v2589_v47  ;;  %v2336_v47 = vpack.c.bf16 %v2060_v44, %v2058_v43  ;;  %v733_v43 = vld [vmem:[%s3635_s5 + $0xa0] sm:$0xff]  ;;  %v735_v44 = vld [vmem:[%s3635_s5 + $0xb0] sm:$0xff] }
 0x1d8   :  { %v626_v54 = vsel %vm606_vm7, %v602_v31, %v2023_v48  ;;  %v2050_v31 = vld [vmem:[%s3635_s5 + $0x1c0] sm:$0xff]  ;;  %v2338_v48 = vpack.c.bf16 %v2065_v46, %v2063_v45  ;;  %v738_v45 = vld [vmem:[%s3635_s5 + $0xc8] sm:$0xff]  ;;  %v740_v46 = vld [vmem:[%s3635_s5 + $0xd8] sm:$0xff] }
 0x1d9   :  { %v2591_v49 = vpop.eup %2590  ;;  %v627_v56 = vsel %vm607_vm9, %v603_v33, %v2024_v50  ;;  %v2055_v33 = vld [vmem:[%s3635_s5 + $0x1e8] sm:$0xff]  ;;  %v2328_v35 = vpack.c.bf16 %v2052_v32, %v2050_v31  ;;  %v2064_v50 = vld [vmem:[%s3635_s5 + $0x230] sm:$0xff]  ;;  %v725_v31 = vld [vmem:[%s3635_s5 + $0x60] sm:$0xff] }
 0x1da   :  { %v2593_v51 = vpop.eup %2592  ;;  %v2025_v52 = vadd.f32 -1.0, %v2591_v49  ;;  %v2330_v36 = vpack.c.bf16 %v2057_v34, %v2055_v33  ;;  %v2062_v49 = vld [vmem:[%s3635_s5 + $0x220] sm:$0xff]  ;;  %v727_v32 = vld [vmem:[%s3635_s5 + $0x70] sm:$0xff]  ;;  %v730_v33 = vld [vmem:[%s3635_s5 + $0x88] sm:$0xff] }
 0x1db   :  { %v2026_v53 = vadd.f32 -1.0, %v2593_v51  ;;  %v2067_v51 = vld [vmem:[%s3635_s5 + $0x248] sm:$0xff]  ;;  %v732_v34 = vld [vmem:[%s3635_s5 + $0x98] sm:$0xff] }
 0x1dc   :  { %v628_v55 = vsel %vm608_vm8, %v604_v38, %v2025_v52  ;;  %v2056_v38 = vld [vmem:[%s3635_s5 + $0x1f0] sm:$0xff]  ;;  %v2069_v52 = vld [vmem:[%s3635_s5 + $0x258] sm:$0xff] }
 0x1dd   :  { %v2301_v57 = vpack.c.bf16 %v628_v55, %v626_v54  ;;  %v629_v58 = vsel %vm609_vm10, %v605_v41, %v2026_v53  ;;  %v2332_v41 = vpack.c.bf16 %v2056_v38, %v2054_v37  ;;  %v2340_v53 = vpack.c.bf16 %v2064_v50, %v2062_v49  ;;  %v2066_v55 = vld [vmem:[%s3635_s5 + $0x240] sm:$0xff]  ;;  %v731_v38 = vld [vmem:[%s3635_s5 + $0x90] sm:$0xff] }
 0x1de   :  { %v2298_v60 = vpack.c.bf16 %v629_v58, %v627_v56  ;;  %v2342_v54 = vpack.c.bf16 %v2069_v52, %v2067_v51  ;;  %v2068_v56 = vld [vmem:[%s3635_s5 + $0x250] sm:$0xff]  ;;  %v2071_v58 = vld [vmem:[%s3635_s5 + $0x268] sm:$0xff]  ;;  %v729_v37 = vld [vmem:[%s3635_s5 + $0x80] sm:$0xff] }
 0x1df   :  { %v737_v49 = vld [vmem:[%s3635_s5 + $0xc0] sm:$0xff]  ;;  %v739_v50 = vld [vmem:[%s3635_s5 + $0xd0] sm:$0xff]  ;;  %v742_v51 = vld [vmem:[%s3635_s5 + $0xe8] sm:$0xff] }
 0x1e0   :  { %2300 = vmatprep.subr.msk.bf16.mxu1 %vm2836_vm11, %v2298_v60  ;;  %2392 = vmatprep.subr.msk.bf16.mxu0 %vm2836_vm11, %v2298_v60  ;;  %v744_v52 = vld [vmem:[%s3635_s5 + $0xf8] sm:$0xff] }
 0x1e1   :  { %2303 = vmatpush1.bf16.msk.msra.mxu1 %vm2836_vm11, %v2301_v57  ;;  %2395 = vmatpush1.bf16.msk.msra.mxu0 %vm2836_vm11, %v2301_v57 }
 0x1e2   :  { %2306 = vmatprep.subr.msk.bf16.mxu1 %vm2836_vm11, %v2298_v60  ;;  %v2346_v60 = vpack.c.bf16 %v2073_v59, %v2071_v58  ;;  %v748_v58 = vld [vmem:[%s3635_s5 + $0x118] sm:$0xff] }
 0x1e4   :  { %2029 = vmatmul.mubr.msk.f32.vlgmr.msra.gmra.mrb[2].mxu1 %vm631_vm12, %v630_v63  ;;  %2079 = vmatmul.mubr.msk.f32.vlgmr.msra.gmra.mrb[8].mxu0 %vm631_vm12, %v2076_v0  ;;  %v2348_v63 = vpack.c.bf16 %v2072_v62, %v2070_v61  ;;  %v714_v0 = vld [vmem:[%s3635_s5 + $0x8] sm:$0xff]  ;;  %v745_v61 = vld [vmem:[%s3635_s5 + $0x100] sm:$0xff]  ;;  %v747_v62 = vld [vmem:[%s3635_s5 + $0x110] sm:$0xff] }
 0x1e5   :  { %2309 = vmatpush1.bf16.msk.msra.mxu1 %vm2836_vm11, %v2301_v57  ;;  %822 = vmatprep.mubr.f32.mxu1 %v2653_v12  ;;  %v2344_v57 = vpack.c.bf16 %v2068_v56, %v2066_v55  ;;  %v741_v55 = vld [vmem:[%s3635_s5 + $0xe0] sm:$0xff]  ;;  %v743_v56 = vld [vmem:[%s3635_s5 + $0xf0] sm:$0xff] }
 0x1e6   :  { %2311 = vmatprep.subr.bf16.mxu1 %v2310_v1  ;;  %1313 = vmatprep.mubr.f32.mxu0 %v2653_v12  ;;  %v716_v1 = vld [vmem:[%s3635_s5 + $0x18] sm:$0xff]  ;;  %v2380_v59 = vpack.c.bf16 %v743_v56, %v741_v55  ;;  %v2108_v56 = vld [vmem:[%s3635_s5 + $0x360] sm:$0xff] }
 0x1e7   :  { %v2350_v2 = vpack.c.bf16 %v716_v1, %v714_v0  ;;  %v752_v0 = vld [vmem:[%s3635_s5 + $0x138] sm:$0xff]  ;;  %v2384_v1 = vpack.c.bf16 %v747_v62, %v745_v61  ;;  %v2112_v62 = vld [vmem:[%s3635_s5 + $0x380] sm:$0xff] }
 0x1e8   :  { %2033 = vmatmul.mubr.msk.f32.vlgmr.msra.gmra.mrb[4].mxu1 %vm631_vm12, %v2030_v6  ;;  %v713_v6 = vld [vmem:[%s3635_s5] sm:$0xff] }
 0x1e9   :  { %2313 = vmatpush1.bf16.msra.mxu1 %v2312_v7  ;;  %v715_v7 = vld [vmem:[%s3635_s5 + $0x10] sm:$0xff] }
 0x1ea   :  { %2315 = vmatprep.subr.bf16.mxu1 %v2314_v8  ;;  %v2352_v13 = vpack.c.bf16 %v715_v7, %v713_v6  ;;  %v751_v6 = vld [vmem:[%s3635_s5 + $0x130] sm:$0xff]  ;;  %v2081_v7 = vld [vmem:[%s3635_s5 + $0x288] sm:$0xff] }
 0x1ed   :  { %2317 = vmatpush1.bf16.msra.mxu1 %v2316_v14 }
 0x1ee   :  { %2319 = vmatprep.subr.bf16.mxu1 %v2318_v15  ;;  %v2354_v15 = vpack.c.bf16 %v720_v10, %v718_v9  ;;  %v2083_v9 = vld [vmem:[%s3635_s5 + $0x298] sm:$0xff] }
 0x1f1   :  { %2321 = vmatpush1.bf16.msra.mxu1 %v2320_v20  ;;  %v2356_v20 = vpack.c.bf16 %v719_v17, %v717_v16  ;;  %v2087_v16 = vld [vmem:[%s3635_s5 + $0x2b8] sm:$0xff] }
 0x1f2   :  { %2323 = vmatprep.subr.bf16.mxu1 %v2322_v21  ;;  %v2358_v21 = vpack.c.bf16 %v724_v19, %v722_v18  ;;  %v2084_v19 = vld [vmem:[%s3635_s5 + $0x2a0] sm:$0xff] }
 0x1f5   :  { %2325 = vmatpush1.bf16.msra.mxu1 %v2324_v29  ;;  %v2360_v29 = vpack.c.bf16 %v723_v23, %v721_v22  ;;  %v2091_v22 = vld [vmem:[%s3635_s5 + $0x2d8] sm:$0xff] }
 0x1f6   :  { %2327 = vmatprep.subr.bf16.mxu1 %v2326_v30  ;;  %v2362_v30 = vpack.c.bf16 %v728_v28, %v726_v26  ;;  %v2088_v28 = vld [vmem:[%s3635_s5 + $0x2c0] sm:$0xff] }
 0x1f9   :  { %2329 = vmatpush1.bf16.msra.mxu1 %v2328_v35  ;;  %v2364_v35 = vpack.c.bf16 %v727_v32, %v725_v31  ;;  %v2092_v32 = vld [vmem:[%s3635_s5 + $0x2e0] sm:$0xff] }
 0x1fa   :  { %2331 = vmatprep.subr.bf16.mxu1 %v2330_v36  ;;  %v2366_v36 = vpack.c.bf16 %v732_v34, %v730_v33  ;;  %v2094_v33 = vld [vmem:[%s3635_s5 + $0x2f0] sm:$0xff]  ;;  %v2097_v34 = vld [vmem:[%s3635_s5 + $0x308] sm:$0xff] }
 0x1fd   :  { %2333 = vmatpush1.bf16.msra.mxu1 %v2332_v41  ;;  %v2368_v41 = vpack.c.bf16 %v731_v38, %v729_v37  ;;  %v2096_v38 = vld [vmem:[%s3635_s5 + $0x300] sm:$0xff] }
 0x1fe   :  { %2335 = vmatprep.subr.bf16.mxu1 %v2334_v42  ;;  %v2370_v42 = vpack.c.bf16 %v736_v40, %v734_v39  ;;  %v2098_v39 = vld [vmem:[%s3635_s5 + $0x310] sm:$0xff]  ;;  %v2101_v40 = vld [vmem:[%s3635_s5 + $0x328] sm:$0xff] }
 0x201   :  { %2337 = vmatpush1.bf16.msra.mxu1 %v2336_v47  ;;  %v2372_v47 = vpack.c.bf16 %v735_v44, %v733_v43  ;;  %v2100_v44 = vld [vmem:[%s3635_s5 + $0x320] sm:$0xff] }
 0x202   :  { %2339 = vmatprep.subr.bf16.mxu1 %v2338_v48  ;;  %v2374_v48 = vpack.c.bf16 %v740_v46, %v738_v45  ;;  %v2102_v45 = vld [vmem:[%s3635_s5 + $0x330] sm:$0xff]  ;;  %v2105_v46 = vld [vmem:[%s3635_s5 + $0x348] sm:$0xff] }
 0x205   :  { %2341 = vmatpush1.bf16.msra.mxu1 %v2340_v53  ;;  %v2376_v53 = vpack.c.bf16 %v739_v50, %v737_v49  ;;  %v2104_v50 = vld [vmem:[%s3635_s5 + $0x340] sm:$0xff] }
 0x206   :  { %2343 = vmatprep.subr.bf16.mxu1 %v2342_v54  ;;  %v2378_v54 = vpack.c.bf16 %v744_v52, %v742_v51  ;;  %v2106_v51 = vld [vmem:[%s3635_s5 + $0x350] sm:$0xff]  ;;  %v2109_v52 = vld [vmem:[%s3635_s5 + $0x368] sm:$0xff] }
 0x209   :  { %2345 = vmatpush1.bf16.msra.mxu1 %v2344_v57  ;;  %v746_v57 = vld [vmem:[%s3635_s5 + $0x108] sm:$0xff] }
 0x20a   :  { %2347 = vmatprep.subr.bf16.mxu1 %v2346_v60  ;;  %v2382_v60 = vpack.c.bf16 %v748_v58, %v746_v57  ;;  %v2110_v57 = vld [vmem:[%s3635_s5 + $0x370] sm:$0xff]  ;;  %v2113_v58 = vld [vmem:[%s3635_s5 + $0x388] sm:$0xff] }
 0x20d   :  { %2349 = vmatpush1.bf16.msra.mxu1 %v2348_v63  ;;  %v750_v63 = vld [vmem:[%s3635_s5 + $0x128] sm:$0xff] }
 0x20e   :  { %2351 = vmatprep.subr.bf16.mxu1 %v2350_v2  ;;  %v2386_v2 = vpack.c.bf16 %v752_v0, %v750_v63  ;;  %v2114_v63 = vld [vmem:[%s3635_s5 + $0x390] sm:$0xff]  ;;  %v2117_v0 = vld [vmem:[%s3635_s5 + $0x3a8] sm:$0xff] }
 0x2b7   :  { %v2992_v3 = vpop.f32.mrb[2].mxu1  ;;  %v2994_v4 = vpop.f32.mrb[8].mxu0 }
 0x2b8   :  { %v710_v5 = vpop.f32.mrb[3].mxu1  ;;  %v3002_v8 = vpop.f32.mrb[9].mxu0 }
 0x2bb   :  { %v824_v11 = vpop.f32.mrb[4].mxu1 }
 0x2bc   :  { %v826_v14 = vpop.f32.mrb[5].mxu1 }
 0x2bd   :  { %2074 = vmatprep.mubr.msk.f32.mxu1 %vm870_vm13, %v826_v14  ;;  %v2082_v14 = vld [vmem:[%s3635_s5 + $0x290] sm:$0xff] }
 0x2be   :  { %939 = vmatmul.mubr.f32.vlgmr.msra.gmra.mrb[6].mxu1 %v824_v11  ;;  %v2396_v11 = vpack.c.bf16 %v2083_v9, %v2081_v7  ;;  %v2118_v7 = vld [vmem:[%s3635_s5 + $0x3b0] sm:$0xff] }
 0x2bf   :  { %2353 = vmatpush1.bf16.msra.mxu1 %v2352_v13  ;;  %2075 = vmatprep.mubr.msk.f32.mxu1 %vm870_vm13, %v710_v5  ;;  %v749_v5 = vld [vmem:[%s3635_s5 + $0x120] sm:$0xff] }
 0x2c0   :  { %2355 = vmatprep.subr.bf16.mxu1 %v2354_v15  ;;  %v2388_v10 = vpack.c.bf16 %v751_v6, %v749_v5  ;;  %v2080_v13 = vld [vmem:[%s3635_s5 + $0x280] sm:$0xff]  ;;  %v2085_v15 = vld [vmem:[%s3635_s5 + $0x2a8] sm:$0xff] }
 0x2c1   :  { %v2398_v17 = vpack.c.bf16 %v2082_v14, %v2080_v13  ;;  %v2400_v18 = vpack.c.bf16 %v2087_v16, %v2085_v15  ;;  %v2116_v6 = vld [vmem:[%s3635_s5 + $0x3a0] sm:$0xff] }
 0x2c2   :  { %v2434_v9 = vpack.c.bf16 %v2118_v7, %v2116_v6 }
 0x2c3   :  { %2357 = vmatpush1.bf16.msra.mxu1 %v2356_v20  ;;  %v2086_v20 = vld [vmem:[%s3635_s5 + $0x2b0] sm:$0xff] }
 0x2c4   :  { %2359 = vmatprep.subr.bf16.mxu1 %v2358_v21  ;;  %v2089_v21 = vld [vmem:[%s3635_s5 + $0x2c8] sm:$0xff]  ;;  %v2402_v23 = vpack.c.bf16 %v2086_v20, %v2084_v19 }
 0x2c5   :  { %v2404_v26 = vpack.c.bf16 %v2091_v22, %v2089_v21 }
 0x2c7   :  { %2361 = vmatpush1.bf16.msra.mxu1 %v2360_v29  ;;  %v2090_v29 = vld [vmem:[%s3635_s5 + $0x2d0] sm:$0xff] }
 0x2c8   :  { %2363 = vmatprep.subr.bf16.mxu1 %v2362_v30  ;;  %v2093_v30 = vld [vmem:[%s3635_s5 + $0x2e8] sm:$0xff] }
 0x2cb   :  { %2365 = vmatpush1.bf16.msra.mxu1 %v2364_v35  ;;  %v2099_v35 = vld [vmem:[%s3635_s5 + $0x318] sm:$0xff] }
 0x2cc   :  { %2367 = vmatprep.subr.bf16.mxu1 %v2366_v36  ;;  %v2410_v36 = vpack.c.bf16 %v2094_v33, %v2092_v32  ;;  %v2412_v37 = vpack.c.bf16 %v2099_v35, %v2097_v34  ;;  %v2133_v32 = vld [vmem:[%s3638_s8 + $0xd8] sm:$0xff]  ;;  %v2134_v34 = vld [vmem:[%s3638_s8 + $0xe0] sm:$0xff]  ;;  %v2135_v35 = vld [vmem:[%s3638_s8 + $0xe8] sm:$0xff] }
 0x2cf   :  { %2369 = vmatpush1.bf16.msra.mxu1 %v2368_v41  ;;  %v2103_v41 = vld [vmem:[%s3635_s5 + $0x338] sm:$0xff] }
 0x2d0   :  { %2371 = vmatprep.subr.bf16.mxu1 %v2370_v42  ;;  %v2414_v42 = vpack.c.bf16 %v2098_v39, %v2096_v38  ;;  %v2416_v43 = vpack.c.bf16 %v2103_v41, %v2101_v40  ;;  %v2137_v38 = vld [vmem:[%s3638_s8 + $0xf8] sm:$0xff]  ;;  %v2138_v40 = vld [vmem:[%s3638_s8 + $0x100] sm:$0xff]  ;;  %v2139_v41 = vld [vmem:[%s3638_s8 + $0x108] sm:$0xff] }
 0x2d3   :  { %2373 = vmatpush1.bf16.msra.mxu1 %v2372_v47  ;;  %v2107_v47 = vld [vmem:[%s3635_s5 + $0x358] sm:$0xff] }
 0x2d4   :  { %2375 = vmatprep.subr.bf16.mxu1 %v2374_v48  ;;  %v2418_v48 = vpack.c.bf16 %v2102_v45, %v2100_v44  ;;  %v2420_v49 = vpack.c.bf16 %v2107_v47, %v2105_v46  ;;  %v2141_v44 = vld [vmem:[%s3638_s8 + $0x118] sm:$0xff]  ;;  %v2142_v46 = vld [vmem:[%s3638_s8 + $0x120] sm:$0xff]  ;;  %v2143_v47 = vld [vmem:[%s3638_s8 + $0x128] sm:$0xff] }
 0x2d7   :  { %2377 = vmatpush1.bf16.msra.mxu1 %v2376_v53  ;;  %v2111_v53 = vld [vmem:[%s3635_s5 + $0x378] sm:$0xff] }
 0x2d8   :  { %2379 = vmatprep.subr.bf16.mxu1 %v2378_v54  ;;  %v2422_v54 = vpack.c.bf16 %v2106_v51, %v2104_v50  ;;  %v2424_v55 = vpack.c.bf16 %v2111_v53, %v2109_v52  ;;  %v2145_v50 = vld [vmem:[%s3638_s8 + $0x138] sm:$0xff]  ;;  %v2146_v52 = vld [vmem:[%s3638_s8 + $0x140] sm:$0xff]  ;;  %v2147_v53 = vld [vmem:[%s3638_s8 + $0x148] sm:$0xff] }
 0x2db   :  { %2381 = vmatpush1.bf16.msra.mxu1 %v2380_v59  ;;  %v2115_v59 = vld [vmem:[%s3635_s5 + $0x398] sm:$0xff] }
 0x2dc   :  { %2383 = vmatprep.subr.bf16.mxu1 %v2382_v60  ;;  %v2426_v60 = vpack.c.bf16 %v2110_v57, %v2108_v56  ;;  %v2428_v61 = vpack.c.bf16 %v2115_v59, %v2113_v58  ;;  %v2149_v56 = vld [vmem:[%s3638_s8 + $0x158] sm:$0xff]  ;;  %v2150_v58 = vld [vmem:[%s3638_s8 + $0x160] sm:$0xff]  ;;  %v2151_v59 = vld [vmem:[%s3638_s8 + $0x168] sm:$0xff] }
 0x2df   :  { %2385 = vmatpush1.bf16.msra.mxu1 %v2384_v1  ;;  %v2119_v1 = vld [vmem:[%s3635_s5 + $0x3b8] sm:$0xff] }
 0x2e0   :  { %2387 = vmatprep.subr.bf16.mxu1 %v2386_v2  ;;  %v2430_v2 = vpack.c.bf16 %v2114_v63, %v2112_v62  ;;  %v2432_v5 = vpack.c.bf16 %v2119_v1, %v2117_v0  ;;  %v2153_v62 = vld [vmem:[%s3638_s8 + $0x178] sm:$0xff] }
 0x2e3   :  { %2389 = vmatpush1.bf16.msra.mxu1 %v2388_v10  ;;  %v2654_v10 = vmov 0.0|0.0  }
 0x2e4   :  { %2397 = vmatprep.subr.bf16.mxu1 %v2396_v11  ;;  %v1212_v11 = vld [vmem:[%s3636_s6] sm:$0x3] }
 0x2e5   :  { %v1217_v13 = vrot.slane %v1212_v11, %v594_v25  ;;  %v1221_v14 = vrot.slane %v1212_v11, %v598_v27  ;;  %v1322_v11 = vld [vmem:[%s3638_s8 + $0x10] sm:$0xff] }
 0x2e6   :  { %1013 = vmatmul.mubr.f32.vlgmr.msra.gmra.mrb[6].mxu1 %v2992_v3  ;;  %v2095_v3 = vld [vmem:[%s3635_s5 + $0x2f8] sm:$0xff] }
 0x2e7   :  { %2399 = vmatpush1.bf16.msra.mxu1 %v2398_v17  ;;  %2120 = vmatprep.mubr.msk.f32.mxu1 %vm870_vm13, %v3002_v8  ;;  %v2406_v8 = vpack.c.bf16 %v2090_v29, %v2088_v28  ;;  %v2408_v31 = vpack.c.bf16 %v2095_v3, %v2093_v30  ;;  %v2130_v29 = vld [vmem:[%s3638_s8 + $0xc0] sm:$0xff]  ;;  %v2131_v30 = vld [vmem:[%s3638_s8 + $0xc8] sm:$0xff] }
 0x2e8   :  { %2401 = vmatprep.subr.bf16.mxu1 %v2400_v18  ;;  %v2126_v3 = vld [vmem:[%s3637_s7 + $0x2] sm:$0x3] }
 0x2eb   :  { %2403 = vmatpush1.bf16.msra.mxu1 %v2402_v23 }
 0x2ec   :  { %2405 = vmatprep.subr.bf16.mxu1 %v2404_v26 }
 0x2ef   :  { %2407 = vmatpush1.bf16.msra.mxu1 %v2406_v8  ;;  %v2437_v8 = vpack.c.bf16 %v2131_v30, %v2130_v29  ;;  %v1333_v29 = vld [vmem:[%s3638_s8 + $0x68] sm:$0xff] }
 0x2f0   :  { %2409 = vmatprep.subr.bf16.mxu1 %v2408_v31  ;;  %v2132_v31 = vld [vmem:[%s3638_s8 + $0xd0] sm:$0xff] }
 0x2f1   :  { %v2440_v33 = vpack.c.bf16 %v2133_v32, %v2132_v31  ;;  %v1336_v32 = vld [vmem:[%s3638_s8 + $0x80] sm:$0xff] }
 0x2f3   :  { %2411 = vmatpush1.bf16.msra.mxu1 %v2410_v36  ;;  %v2443_v36 = vpack.c.bf16 %v2135_v35, %v2134_v34  ;;  %v1338_v35 = vld [vmem:[%s3638_s8 + $0x90] sm:$0xff] }
 0x2f4   :  { %2413 = vmatprep.subr.bf16.mxu1 %v2412_v37  ;;  %v2136_v37 = vld [vmem:[%s3638_s8 + $0xf0] sm:$0xff] }
 0x2f5   :  { %v2446_v39 = vpack.c.bf16 %v2137_v38, %v2136_v37  ;;  %v1340_v38 = vld [vmem:[%s3638_s8 + $0xa0] sm:$0xff] }
 0x2f7   :  { %2415 = vmatpush1.bf16.msra.mxu1 %v2414_v42  ;;  %v2449_v42 = vpack.c.bf16 %v2139_v41, %v2138_v40  ;;  %v1342_v41 = vld [vmem:[%s3638_s8 + $0xb0] sm:$0xff] }
 0x2f8   :  { %2417 = vmatprep.subr.bf16.mxu1 %v2416_v43  ;;  %v2140_v43 = vld [vmem:[%s3638_s8 + $0x110] sm:$0xff] }
 0x2f9   :  { %v2452_v45 = vpack.c.bf16 %v2141_v44, %v2140_v43  ;;  %v2156_v44 = vld [vmem:[%s3637_s7 + $0x4] sm:$0x3] }
 0x2fb   :  { %2419 = vmatpush1.bf16.msra.mxu1 %v2418_v48  ;;  %v2455_v48 = vpack.c.bf16 %v2143_v47, %v2142_v46  ;;  %v2163_v47 = vld [vmem:[%s3638_s8 + $0x198] sm:$0xff] }
 0x2fc   :  { %2421 = vmatprep.subr.bf16.mxu1 %v2420_v49  ;;  %v2144_v49 = vld [vmem:[%s3638_s8 + $0x130] sm:$0xff] }
 0x2fd   :  { %v2458_v51 = vpack.c.bf16 %v2145_v50, %v2144_v49  ;;  %v2164_v49 = vld [vmem:[%s3638_s8 + $0x1a0] sm:$0xff]  ;;  %v2165_v50 = vld [vmem:[%s3638_s8 + $0x1a8] sm:$0xff] }
 0x2ff   :  { %2423 = vmatpush1.bf16.msra.mxu1 %v2422_v54  ;;  %v2461_v54 = vpack.c.bf16 %v2147_v53, %v2146_v52  ;;  %v2166_v52 = vld [vmem:[%s3638_s8 + $0x1b0] sm:$0xff]  ;;  %v2167_v53 = vld [vmem:[%s3638_s8 + $0x1b8] sm:$0xff] }
 0x300   :  { %2425 = vmatprep.subr.bf16.mxu1 %v2424_v55  ;;  %v2148_v55 = vld [vmem:[%s3638_s8 + $0x150] sm:$0xff] }
 0x301   :  { %v2464_v57 = vpack.c.bf16 %v2149_v56, %v2148_v55  ;;  %v2168_v55 = vld [vmem:[%s3638_s8 + $0x1c0] sm:$0xff]  ;;  %v2169_v56 = vld [vmem:[%s3638_s8 + $0x1c8] sm:$0xff] }
 0x303   :  { %2427 = vmatpush1.bf16.msra.mxu1 %v2426_v60  ;;  %v2467_v60 = vpack.c.bf16 %v2151_v59, %v2150_v58  ;;  %v2170_v58 = vld [vmem:[%s3638_s8 + $0x1d0] sm:$0xff]  ;;  %v2171_v59 = vld [vmem:[%s3638_s8 + $0x1d8] sm:$0xff] }
 0x304   :  { %2429 = vmatprep.subr.bf16.mxu1 %v2428_v61  ;;  %v2152_v61 = vld [vmem:[%s3638_s8 + $0x170] sm:$0xff] }
 0x305   :  { %v2470_v63 = vpack.c.bf16 %v2153_v62, %v2152_v61  ;;  %v2172_v61 = vld [vmem:[%s3638_s8 + $0x1e0] sm:$0xff]  ;;  %v2173_v62 = vld [vmem:[%s3638_s8 + $0x1e8] sm:$0xff] }
 0x307   :  { %2431 = vmatpush1.bf16.msra.mxu1 %v2430_v2  ;;  %v1320_v2 = vld [vmem:[%s3638_s8] sm:$0xff] }
 0x308   :  { %2433 = vmatprep.subr.bf16.mxu1 %v2432_v5  ;;  %v1321_v5 = vld [vmem:[%s3638_s8 + $0x8] sm:$0xff] }
 0x309   :  { %v2473_v7 = vpack.c.bf16 %v1321_v5, %v1320_v2  ;;  %v2176_v5 = vld [vmem:[%s3638_s8 + $0x200] sm:$0xff] }
 0x30b   :  { %2435 = vmatpush1.bf16.msra.mxu1 %v2434_v9 }
 0x30c   :  { %2508 = vmatprep.subr.bf16.mxu1 %v2654_v10 }
 0x30e   :  { %1204 = vmatmul.mubr.f32.vlgmr.msra.gmra.mrb[6].mxu1 %v2994_v4 }
 0x3e1   :  { %v1205_v15 = vpop.f32.mrb[6].mxu1 }
 0x3e2   :  { %v1224_v16 = vadd.f32 %v1217_v13, %v1205_v15  ;;  %v1207_v17 = vpop.f32.mrb[7].mxu1  ;;  %v1323_v13 = vld [vmem:[%s3638_s8 + $0x18] sm:$0xff]  ;;  %v1324_v15 = vld [vmem:[%s3638_s8 + $0x20] sm:$0xff] }
 0x3e3   :  { %v1225_v18 = vadd.f32 %v1221_v14, %v1207_v17  ;;  %v2476_v14 = vpack.c.bf16 %v1323_v13, %v1322_v11  ;;  %v2179_v11 = vld [vmem:[%s3638_s8 + $0x218] sm:$0xff] }
 0x3e4   :  { %v1228_v19 = vmin.f32 %v1224_v16, 0.0  ;;  %vm1226_vm15 = vcmp.gt.f32.partialorder %v1224_v16, 0.0 }
 0x3e5   :  { %v1229_v20 = vmin.f32 %v1225_v18, 0.0  ;;  %vm1227_vm14 = vcmp.gt.f32.partialorder %v1225_v18, 0.0 }
 0x3e6   :  { %v1230_v4 = vmul.f32 1.442695, %v1228_v19  ;;  %v1327_v19 = vld [vmem:[%s3638_s8 + $0x38] sm:$0xff] }
 0x3e7   :  { %v1232_v21 = vmul.f32 1.442695, %v1229_v20 }
 0x3e8   :  { %2594 = vpow2.f32 %v1230_v4  ;;  %v1328_v4 = vld [vmem:[%s3638_s8 + $0x40] sm:$0xff] }
 0x3e9   :  { %2596 = vpow2.f32 %v1232_v21  ;;  %v1329_v21 = vld [vmem:[%s3638_s8 + $0x48] sm:$0xff] }
 0x3f2   :  { %v2595_v22 = vpop.eup %2594 }
 0x3f3   :  { %v2597_v23 = vpop.eup %2596  ;;  %v2121_v26 = vadd.f32 -1.0, %v2595_v22  ;;  %v2485_v22 = vpack.c.bf16 %v1329_v21, %v1328_v4 }
 0x3f4   :  { %v2122_v28 = vadd.f32 -1.0, %v2597_v23  ;;  %v1330_v23 = vld [vmem:[%s3638_s8 + $0x50] sm:$0xff] }
 0x3f5   :  { %v3251_v27 = vsel %vm1226_vm15, %v1224_v16, %v2121_v26  ;;  %v1325_v16 = vld [vmem:[%s3638_s8 + $0x28] sm:$0xff]  ;;  %v1331_v26 = vld [vmem:[%s3638_s8 + $0x58] sm:$0xff] }
 0x3f6   :  { %v3246_v25 = vsel %vm1227_vm14, %v1225_v18, %v2122_v28  ;;  %v2479_v17 = vpack.c.bf16 %v1325_v16, %v1324_v15  ;;  %v1326_v18 = vld [vmem:[%s3638_s8 + $0x30] sm:$0xff]  ;;  %v2488_v28 = vpack.c.bf16 %v1331_v26, %v1330_v23  ;;  %v2181_v15 = vld [vmem:[%s3638_s8 + $0x228] sm:$0xff] }
 0x3f7   :  { %2123 = vmatprep.subr.msk.mxu0 %vm62_vm0, %v3246_v25  ;;  %v2482_v20 = vpack.c.bf16 %v1327_v19, %v1326_v18  ;;  %v2183_v18 = vld [vmem:[%s3638_s8 + $0x238] sm:$0xff] }
 0x3f8   :  { %2124 = vmatpush1.msk.msra.mxu0 %vm62_vm0, %v3251_v27 }
 0x3f9   :  { %2125 = vmatmul.mubr.msk.f32.vlgmr.msra.gmra.mrb[10].mxu0 %vm1239_vm1, %v1238_v24  ;;  %2127 = vmatprep.subr.msk.mxu0 %vm62_vm0, %v3246_v25  ;;  %v1332_v24 = vld [vmem:[%s3638_s8 + $0x60] sm:$0xff] }
 0x3fa   :  { %2128 = vmatpush1.msk.msra.mxu0 %vm62_vm0, %v3251_v27  ;;  %1413 = vmatprep.mubr.f32.mxu0 %v2653_v12  ;;  %v2491_v30 = vpack.c.bf16 %v1333_v29, %v1332_v24  ;;  %v1781_v24 = vld [vmem:[%s3640_s10] sm:$0xff]  ;;  %v1782_v29 = vld [vmem:[%s3640_s10 + $0x8] sm:$0xff] }
 0x3fb   :  { %2436 = vmatprep.subr.bf16.mxu0 %v2654_v10 }
 0x3fd   :  { %2129 = vmatmul.mubr.msk.f32.vlgmr.msra.gmra.mrb[12].mxu0 %vm1239_vm1, %v2126_v3  ;;  %v1334_v3 = vld [vmem:[%s3638_s8 + $0x70] sm:$0xff] }
 0x3fe   :  { %2438 = vmatpush1.bf16.msra.mxu0 %v2437_v8  ;;  %v1335_v8 = vld [vmem:[%s3638_s8 + $0x78] sm:$0xff] }
 0x3ff   :  { %2439 = vmatprep.subr.bf16.mxu0 %v2654_v10  ;;  %v2494_v31 = vpack.c.bf16 %v1335_v8, %v1334_v3  ;;  %v1783_v3 = vld [vmem:[%s3640_s10 + $0x10] sm:$0xff]  ;;  %v1784_v8 = vld [vmem:[%s3640_s10 + $0x18] sm:$0xff] }
 0x402   :  { %2441 = vmatpush1.bf16.msra.mxu0 %v2440_v33  ;;  %v1337_v33 = vld [vmem:[%s3638_s8 + $0x88] sm:$0xff] }
 0x403   :  { %2442 = vmatprep.subr.bf16.mxu0 %v2654_v10  ;;  %v2497_v34 = vpack.c.bf16 %v1337_v33, %v1336_v32  ;;  %v1785_v32 = vld [vmem:[%s3640_s10 + $0x20] sm:$0xff]  ;;  %v1786_v33 = vld [vmem:[%s3640_s10 + $0x28] sm:$0xff] }
 0x406   :  { %2444 = vmatpush1.bf16.msra.mxu0 %v2443_v36  ;;  %v1339_v36 = vld [vmem:[%s3638_s8 + $0x98] sm:$0xff] }
 0x407   :  { %2445 = vmatprep.subr.bf16.mxu0 %v2654_v10  ;;  %v2500_v37 = vpack.c.bf16 %v1339_v36, %v1338_v35  ;;  %v1787_v35 = vld [vmem:[%s3640_s10 + $0x30] sm:$0xff]  ;;  %v1788_v36 = vld [vmem:[%s3640_s10 + $0x38] sm:$0xff] }
 0x40a   :  { %2447 = vmatpush1.bf16.msra.mxu0 %v2446_v39  ;;  %v1341_v39 = vld [vmem:[%s3638_s8 + $0xa8] sm:$0xff] }
 0x40b   :  { %2448 = vmatprep.subr.bf16.mxu0 %v2654_v10  ;;  %v2503_v40 = vpack.c.bf16 %v1341_v39, %v1340_v38  ;;  %v2185_v39 = vld [vmem:[%s3639_s9] ss:$0 sm:$0xff] }
 0x40e   :  { %2450 = vmatpush1.bf16.msra.mxu0 %v2449_v42  ;;  %v1343_v42 = vld [vmem:[%s3638_s8 + $0xb8] sm:$0xff] }
 0x40f   :  { %2451 = vmatprep.subr.bf16.mxu0 %v2654_v10  ;;  %v2506_v43 = vpack.c.bf16 %v1343_v42, %v1342_v41 }
 0x412   :  { %2453 = vmatpush1.bf16.msra.mxu0 %v2452_v45  ;;  %v2160_v45 = vld [vmem:[%s3638_s8 + $0x180] sm:$0xff] }
 0x413   :  { %2454 = vmatprep.subr.bf16.mxu0 %v2654_v10 }
 0x416   :  { %2456 = vmatpush1.bf16.msra.mxu0 %v2455_v48 }
 0x417   :  { %2457 = vmatprep.subr.bf16.mxu0 %v2654_v10 }
 0x41a   :  { %2459 = vmatpush1.bf16.msra.mxu0 %v2458_v51  ;;  %v2515_v51 = vpack.c.bf16 %v2165_v50, %v2164_v49  ;;  %v1872_v49 = vld [vmem:[%s3642_s12 + $0x18] sm:$0xff] }
 0x41b   :  { %2460 = vmatprep.subr.bf16.mxu0 %v2654_v10 }
 0x41e   :  { %2462 = vmatpush1.bf16.msra.mxu0 %v2461_v54  ;;  %v2518_v54 = vpack.c.bf16 %v2167_v53, %v2166_v52  ;;  %v1873_v52 = vld [vmem:[%s3642_s12 + $0x20] sm:$0xff]  ;;  %v1874_v53 = vld [vmem:[%s3642_s12 + $0x28] sm:$0xff] }
 0x41f   :  { %2463 = vmatprep.subr.bf16.mxu0 %v2654_v10 }
 0x422   :  { %2465 = vmatpush1.bf16.msra.mxu0 %v2464_v57  ;;  %v2521_v57 = vpack.c.bf16 %v2169_v56, %v2168_v55  ;;  %v1875_v55 = vld [vmem:[%s3642_s12 + $0x30] sm:$0xff] }
 0x423   :  { %2466 = vmatprep.subr.bf16.mxu0 %v2654_v10 }
 0x426   :  { %2468 = vmatpush1.bf16.msra.mxu0 %v2467_v60  ;;  %v2524_v60 = vpack.c.bf16 %v2171_v59, %v2170_v58 }
 0x427   :  { %2469 = vmatprep.subr.bf16.mxu0 %v2654_v10 }
 0x42a   :  { %2471 = vmatpush1.bf16.msra.mxu0 %v2470_v63  ;;  %v2527_v63 = vpack.c.bf16 %v2173_v62, %v2172_v61 }
 0x42b   :  { %2472 = vmatprep.subr.bf16.mxu0 %v2654_v10 }
 0x4cc   :  { %v3352_v0 = vpop.f32.mrb[10].mxu0 }
 0x4cd   :  { %v1317_v1 = vpop.f32.mrb[11].mxu0 }
 0x4d0   :  { %v1415_v6 = vpop.f32.mrb[12].mxu0 }
 0x4d1   :  { %v1417_v9 = vpop.f32.mrb[13].mxu0 }
 0x4d2   :  { %2154 = vmatprep.mubr.msk.f32.mxu0 %vm1445_vm2, %v1417_v9  ;;  %v2178_v9 = vld [vmem:[%s3638_s8 + $0x210] sm:$0xff] }
 0x4d3   :  { %1514 = vmatmul.mubr.f32.vlgmr.msra.gmra.mrb[14].mxu0 %v1415_v6  ;;  %v2177_v6 = vld [vmem:[%s3638_s8 + $0x208] sm:$0xff]  ;;  %v2536_v13 = vpack.c.bf16 %v2179_v11, %v2178_v9 }
 0x4d4   :  { %2474 = vmatpush1.bf16.msra.mxu0 %v2473_v7  ;;  %2155 = vmatprep.mubr.msk.f32.mxu0 %vm1445_vm2, %v1317_v1  ;;  %v2175_v1 = vld [vmem:[%s3638_s8 + $0x1f8] sm:$0xff]  ;;  %v2533_v7 = vpack.c.bf16 %v2177_v6, %v2176_v5 }
 0x4d5   :  { %2475 = vmatprep.subr.bf16.mxu0 %v2654_v10 }
 0x4d8   :  { %2477 = vmatpush1.bf16.msra.mxu0 %v2476_v14  ;;  %v2180_v14 = vld [vmem:[%s3638_s8 + $0x220] sm:$0xff] }
 0x4d9   :  { %2478 = vmatprep.subr.bf16.mxu0 %v2654_v10  ;;  %v2539_v16 = vpack.c.bf16 %v2181_v15, %v2180_v14 }
 0x4dc   :  { %2480 = vmatpush1.bf16.msra.mxu0 %v2479_v17  ;;  %v2182_v17 = vld [vmem:[%s3638_s8 + $0x230] sm:$0xff] }
 0x4dd   :  { %2481 = vmatprep.subr.bf16.mxu0 %v2654_v10  ;;  %v2542_v19 = vpack.c.bf16 %v2183_v18, %v2182_v17 }
 0x4e0   :  { %2483 = vmatpush1.bf16.msra.mxu0 %v2482_v20 }
 0x4e1   :  { %2484 = vmatprep.subr.bf16.mxu0 %v2654_v10 }
 0x4e4   :  { %2486 = vmatpush1.bf16.msra.mxu0 %v2485_v22 }
 0x4e5   :  { %2487 = vmatprep.subr.bf16.mxu0 %v2654_v10 }
 0x4e8   :  { %2489 = vmatpush1.bf16.msra.mxu0 %v2488_v28 }
 0x4e9   :  { %2490 = vmatprep.subr.bf16.mxu0 %v2654_v10 }
 0x4ec   :  { %2492 = vmatpush1.bf16.msra.mxu0 %v2491_v30  ;;  %v2545_v30 = vpack.c.bf16 %v1782_v29, %v1781_v24 }
 0x4ed   :  { %2493 = vmatprep.subr.bf16.mxu0 %v2654_v10 }
 0x4f0   :  { %2495 = vmatpush1.bf16.msra.mxu0 %v2494_v31  ;;  %v2548_v31 = vpack.c.bf16 %v1784_v8, %v1783_v3 }
 0x4f1   :  { %2496 = vmatprep.subr.bf16.mxu0 %v2654_v10 }
 0x4f4   :  { %2498 = vmatpush1.bf16.msra.mxu0 %v2497_v34  ;;  %v2551_v34 = vpack.c.bf16 %v1786_v33, %v1785_v32 }
 0x4f5   :  { %2499 = vmatprep.subr.bf16.mxu0 %v2654_v10 }
 0x4f8   :  { %2501 = vmatpush1.bf16.msra.mxu0 %v2500_v37  ;;  %v2554_v37 = vpack.c.bf16 %v1788_v36, %v1787_v35 }
 0x4f9   :  { %2502 = vmatprep.subr.bf16.mxu0 %v2654_v10 }
 0x4fc   :  { %2504 = vmatpush1.bf16.msra.mxu0 %v2503_v40 }
 0x4fd   :  { %2505 = vmatprep.subr.bf16.mxu0 %v2654_v10 }
 0x500   :  { %2507 = vmatpush1.bf16.msra.mxu0 %v2506_v43 }
 0x501   :  { %2157 = vmatprep.subr.msk.mxu0 %vm62_vm0, %v3246_v25  ;;  %v2161_v25 = vld [vmem:[%s3638_s8 + $0x188] sm:$0xff] }
 0x502   :  { %v2509_v46 = vpack.c.bf16 %v2161_v25, %v2160_v45  ;;  %v1869_v45 = vld [vmem:[%s3642_s12] sm:$0xff]  ;;  %v1870_v25 = vld [vmem:[%s3642_s12 + $0x8] sm:$0xff] }
 0x503   :  { %1587 = vmatmul.mubr.f32.vlgmr.msra.gmra.mrb[16].mxu0 %v3352_v0  ;;  %v2174_v0 = vld [vmem:[%s3638_s8 + $0x1f0] sm:$0xff] }
 0x504   :  { %2158 = vmatpush1.msk.msra.mxu0 %vm62_vm0, %v3251_v27  ;;  %1661 = vmatprep.mubr.f32.mxu0 %v2653_v12  ;;  %v2162_v27 = vld [vmem:[%s3638_s8 + $0x190] sm:$0xff]  ;;  %v2530_v2 = vpack.c.bf16 %v2175_v1, %v2174_v0  ;;  %vm2655_vm0 = vmmov 0  }
 0x505   :  { %2544 = vmatprep.subr.bf16.mxu0 %v2654_v10  ;;  %2510 = vmatpush1.bf16.msra.mxu1 %v2509_v46  ;;  %v2512_v48 = vpack.c.bf16 %v2163_v47, %v2162_v27  ;;  %v2557_v47 = vpack.c.bf16 %v1870_v25, %v1869_v45 }
 0x506   :  { %2511 = vmatprep.subr.bf16.mxu1 %v2654_v10 }
 0x507   :  { %2159 = vmatmul.mubr.msk.f32.vlgmr.msra.gmra.mrb[18].mxu0 %vm1239_vm1, %v2156_v44 }
 0x508   :  { %2546 = vmatpush3.bf16.msra.mxu0 %v2545_v30  ;;  %2258 = vmatprep.mubr.msk.f32.mxu0 %vm2655_vm0, %v2653_v12 }
 0x509   :  { %2513 = vmatpush1.bf16.msra.mxu1 %v2512_v48  ;;  %2547 = vmatprep.subr.bf16.mxu0 %v2654_v10  ;;  %v1871_v48 = vld [vmem:[%s3642_s12 + $0x10] sm:$0xff] }
 0x50a   :  { %2514 = vmatprep.subr.bf16.mxu1 %v2654_v10 }
 0x50c   :  { %2549 = vmatpush3.bf16.msra.mxu0 %v2548_v31 }
 0x50d   :  { %2516 = vmatpush1.bf16.msra.mxu1 %v2515_v51  ;;  %2550 = vmatprep.subr.bf16.mxu0 %v2654_v10  ;;  %v2560_v51 = vpack.c.bf16 %v1872_v49, %v1871_v48 }
 0x50e   :  { %2517 = vmatprep.subr.bf16.mxu1 %v2654_v10 }
 0x510   :  { %2552 = vmatpush3.bf16.msra.mxu0 %v2551_v34 }
 0x511   :  { %2519 = vmatpush1.bf16.msra.mxu1 %v2518_v54  ;;  %2553 = vmatprep.subr.bf16.mxu0 %v2654_v10  ;;  %v2563_v54 = vpack.c.bf16 %v1874_v53, %v1873_v52 }
 0x512   :  { %2520 = vmatprep.subr.bf16.mxu1 %v2654_v10 }
 0x514   :  { %2555 = vmatpush3.bf16.msra.mxu0 %v2554_v37 }
 0x515   :  { %2522 = vmatpush1.bf16.msra.mxu1 %v2521_v57  ;;  %2556 = vmatprep.subr.bf16.mxu0 %v2654_v10  ;;  %v2187_v57 = vld [vmem:[%s3641_s11] ss:$0 sm:$0xff] }
 0x516   :  { %2523 = vmatprep.subr.bf16.mxu1 %v2654_v10 }
 0x519   :  { %2525 = vmatpush1.bf16.msra.mxu1 %v2524_v60 }
 0x51a   :  { %2526 = vmatprep.subr.bf16.mxu1 %v2654_v10 }
 0x51d   :  { %2528 = vmatpush1.bf16.msra.mxu1 %v2527_v63 }
 0x51e   :  { %2529 = vmatprep.subr.bf16.mxu1 %v2654_v10 }
 0x521   :  { %2531 = vmatpush1.bf16.msra.mxu1 %v2530_v2 }
 0x522   :  { %2532 = vmatprep.subr.bf16.mxu1 %v2654_v10 }
 0x525   :  { %2534 = vmatpush1.bf16.msra.mxu1 %v2533_v7 }
 0x526   :  { %2535 = vmatprep.subr.bf16.mxu1 %v2654_v10 }
 0x529   :  { %2537 = vmatpush1.bf16.msra.mxu1 %v2536_v13 }
 0x52a   :  { %2538 = vmatprep.subr.bf16.mxu1 %v2654_v10 }
 0x52d   :  { %2540 = vmatpush1.bf16.msra.mxu1 %v2539_v16 }
 0x52e   :  { %2541 = vmatprep.subr.bf16.mxu1 %v2654_v10 }
 0x531   :  { %2543 = vmatpush1.bf16.msra.mxu1 %v2542_v19 }
 0x5a6   :  { %v1515_v20 = vpop.f32.mrb[14].mxu0 }
 0x5a7   :  { %v1517_v4 = vpop.f32.mrb[15].mxu0 }
 0x5d6   :  { %v1588_v21 = vpop.f32.mrb[16].mxu0 }
 0x5d7   :  { %v1589_v22 = vadd.f32 %v1588_v21, %v1515_v20  ;;  %v1590_v23 = vpop.f32.mrb[17].mxu0 }
 0x5da   :  { %v1663_v26 = vpop.f32.mrb[18].mxu0 }
 0x5db   :  { %v1665_v28 = vpop.f32.mrb[19].mxu0 }
 0x5dc   :  { %2184 = vmatprep.mubr.msk.f32.mxu1 %vm1445_vm2, %v1665_v28 }
 0x5dd   :  { %1761 = vmatmul.mubr.f32.vlgmr.msra.gmra.mrb[8].mxu1 %v1663_v26 }
 0x6b0   :  { %v1762_v38 = vpop.f32.mrb[8].mxu1 }
 0x6b1   :  { %v1766_v40 = vadd.f32 %v1762_v38, %v1589_v22  ;;  %v1764_v41 = vpop.f32.mrb[9].mxu1 }
 0x6b3   :  { %v1774_v42 = vadd.f32 %v2185_v39, %v1766_v40 }
 0x6b5   :  { %v1776_v43 = vmin.f32 %v1774_v42, 0.0  ;;  %vm1775_vm3 = vcmp.gt.f32.partialorder %v1774_v42, 0.0 }
 0x6b7   :  { %v1777_v44 = vmul.f32 1.442695, %v1776_v43 }
 0x6b9   :  { %2598 = vpow2.f32 %v1777_v44 }
 0x6c3   :  { %v2599_v27 = vpop.eup %2598 }
 0x6c4   :  { %v2186_v46 = vadd.f32 -1.0, %v2599_v27 }
 0x6c6   :  { %v1780_v50 = vsel %vm1775_vm3, %v1774_v42, %v2186_v46 }
 0x6c7   :  { %2259 = vmatmul.mubr.msk.f32.vlgmr.msra.gmra.mrb[20].mxu0 %vm1445_vm2, %v1780_v50 }
 0x6c8   :  { %2558 = vmatpush3.bf16.msra.mxu0 %v2557_v47  ;;  %2277 = vmatprep.mubr.msk.f32.mxu0 %vm2655_vm0, %v2653_v12  ;;  %v1876_v12 = vld [vmem:[%s3642_s12 + $0x38] sm:$0xff]  ;;  %s2604_s12 = scalar_lea.vmem %s1973_s22, 32 }
 0x6c9   :  { %2559 = vmatprep.subr.bf16.mxu0 %v2654_v10  ;;  %v2566_v56 = vpack.c.bf16 %v1876_v12, %v1875_v55  ;;  %p2605_p0 = scmp.ne.s32.totalorder %s1973_s22, %s2604_s12  ;;  %p2610_p2 = scmp.lt.s32.totalorder %s2604_s12, %s2604_s12 }
 0x6cb   :  { %p2611_p3 = por %p2610_p2, %p2609_p1 }
 0x6cc   :  { %2561 = vmatpush3.bf16.msra.mxu0 %v2560_v51 }
 0x6cd   :  { %2562 = vmatprep.subr.bf16.mxu0 %v2654_v10  ;;  %p2612_p4 = pnand %p2611_p3, %p2605_p0 }
 0x6d0   :  { %2564 = vmatpush3.bf16.msra.mxu0 %v2563_v54 }
 0x6d1   :  { %2565 = vmatprep.subr.bf16.mxu0 %v2654_v10 }
 0x6d4   :  { %2567 = vmatpush3.bf16.msra.mxu0 %v2566_v56 }
 0x6d7   :  { %2278 = vmatmul.mubr.msk.f32.vlgmr.msra.gmra.mrb[22].mxu0 %vm1445_vm2, %v1780_v50 }
 0x79a   :  { %v1865_v58 = vpop.f32.mrb[20].mxu0 }
 0x79b   :  { %v1866_v59 = vadd.f32 %v2187_v57, %v1865_v58  ;;  %v2260_v60 = vpop.f32.mrb[21].mxu0 }
 0x79d   :  { %1964 = vst.msk [vmem:[#allocation2] sm:$0x3] %vm1963_vm4, %v1866_v59 }
 0x79e   :  { %2615 = shalt.err (!%p2612_p4)
}
 0x79f   :  { %s2616_s11 = scalar_lea.hbm %s3644_s14, 32 }
 0x7a0   :  { %p2617_p5 = scmp.ne.s32.totalorder %s3644_s14, %s2616_s11  ;;  %p2620_p6 = scmp.lt.u32.totalorder %s2616_s11, %s3644_s14 }
 0x7a2   :  { %p2622_p7 = pnand %p2620_p6, %p2617_p5 }
 0x7a4   :  { %2625 = shalt.err (!%p2622_p7)
}
 0x7a5   :  { %1975 = dma.vmem_to_hbm [thread:$0]  %s1973_s22, 32, %s3644_s14, [#allocation3]   ;;  %v2189_v10 = vld [vmem:[%s3643_s13] ss:$0 sm:$0xff] }
 0x7a6   :  { %s2657_s3 = smov [#allocation4]  }
 0x7a7   :  { %s1982_s9 = sshll.u32 %s2657_s3, 4  ;;  %s1983_s9 = int_to_ptr.vmem [resolvable:$true] %s1982_s9 }
 0x7a8   :  { %s2626_s13 = scalar_lea.vmem %s1983_s9, 32  ;;  %p2631_p9 = scmp.lt.s32.totalorder %s1983_s9, %s1983_s9 }
 0x7a9   :  { %p2627_p8 = scmp.ne.s32.totalorder %s1983_s9, %s2626_s13  ;;  %p2632_p10 = scmp.lt.s32.totalorder %s2626_s13, %s2626_s13 }
 0x7aa   :  { %v1950_v61 = vpop.f32.mrb[22].mxu0 }
 0x7ab   :  { %v1951_v62 = vadd.f32 %v2189_v10, %v1950_v61  ;;  %v2279_v63 = vpop.f32.mrb[23].mxu0  ;;  %p2633_p11 = por %p2632_p10, %p2631_p9 }
 0x7ad   :  { %v1955_v0 = vand.u32 2147483647, %v1951_v62  ;;  %v1954_v9 = vmax.f32 %v1951_v62, 0.0  ;;  %p2634_p12 = pnand %p2633_p11, %p2627_p8 }
 0x7af   :  { %v1956_v1 = vsub.f32 0.0, %v1955_v0 }
 0x7b1   :  { %v1957_v2 = vmul.f32 1.442695, %v1956_v1 }
 0x7b3   :  { %2600 = vpow2.f32 %v1957_v2 }
 0x7bd   :  { %v2601_v5 = vpop.eup %2600 }
 0x7be   :  { %v1959_v6 = vadd.f32 1.0, %v2601_v5 }
 0x7c0   :  { %2602 = vlog2.f32 %v1959_v6 }
 0x7ca   :  { %v2603_v7 = vpop.eup %2602 }
 0x7cb   :  { %v1961_v11 = vmul.f32 0.6931472, %v2603_v7 }
 0x7cd   :  { %v1962_v13 = vadd.f32 %v1961_v11, %v1954_v9 }
 0x7cf   :  { %1965 = vst.msk [vmem:[#allocation4] sm:$0x3] %vm1963_vm4, %v1962_v13 }
 0x7d0   :  { %2637 = shalt.err (!%p2634_p12)
}
 0x7d1   :  { %s2638_s30 = scalar_lea.hbm %s3645_s15, 32 }
 0x7d2   :  { %p2639_p13 = scmp.ne.s32.totalorder %s3645_s15, %s2638_s30  ;;  %p2642_p0 = scmp.lt.u32.totalorder %s2638_s30, %s3645_s15 }
 0x7d4   :  { %p2644_p1 = pnand %p2642_p0, %p2639_p13 }
 0x7d6   :  { %2647 = shalt.err (!%p2644_p1)
}
 0x7d7   :  { %1985 = dma.vmem_to_hbm [thread:$0]  %s1983_s9, 32, %s3645_s15, [#allocation5]  }
 0x7d8   :  { %2648 = dma.done.wait [#allocation3], 32  }
 0x7d9   :  { %2649 = vsyncadd [#allocation3], 4294967264 }
 0x7da   :  { %2650 = dma.done.wait [#allocation5], 32  }
 0x7db   :  { %2651 = vsyncadd [#allocation5], 4294967264 }
 0x7dc   :  { %1992 = vsyncpa [#allocation3], 1 }
 0x7dd   :  { %1993 = vsyncpa [#allocation5], 1 }

</bundles_post_ra>
